<compile_context>
chip_gen: v5e
topology: v5e:2x2
jax: 0.10.0
libtpu: 0.0.40
codegen_flags: <defaults>
</compile_context>

<pallas_src>
import functools

import jax
import jax.numpy as jnp
from jax.experimental import pallas as pl
from jax.experimental.pallas import tpu as pltpu

IN_FEATURES = 48 * 7 * 7    # 2352
HIDDEN = 100
HIDDEN_PAD = 128            # lane-dense hidden width (zero-padded columns are inert)
OUT = 1


def _round_up(x, m):
    return ((x + m - 1) // m) * m


def _device_kind():
    try:
        return jax.devices()[0].device_kind.lower()
    except Exception:
        return ""


def _choose_tile_b(batch, tile_b):
    kind = _device_kind()
    if tile_b is None:
        if "v7" in kind:
            tile_b = 1024          # keep headroom inside 64 MiB/TC VMEM
        elif "v6" in kind or "v5" in kind:
            tile_b = 2048          # 128 MiB VMEM: amortize per-step overhead
        else:
            tile_b = 512
    tb = min(tile_b, batch)
    # v7x has 2 TensorCores: give the "parallel" batch axis >= 2 tiles for
    # medium batches so both cores get work.
    if "v7" in kind and batch >= 16 and pl.cdiv(batch, tb) < 2:
        tb = max(8, _round_up(pl.cdiv(batch, 2), 8))
    # Block second-to-last dim must be a multiple of 8 or equal the full dim.
    if tb != batch and tb % 8 != 0:
        tb = min(batch, _round_up(tb, 8))
    return tb


def _fc1_relu(x_ref, w1_ref, b1_ref, mxu_dtype):
    xv = x_ref[...]
    wv = w1_ref[...]
    if mxu_dtype is not None:
        # v5e option: bf16 MXU operands (f32 accumulation) to keep the matmul
        # off the critical path; on v6e/v7x the f32 path is already DMA-bound.
        xv = xv.astype(mxu_dtype)
        wv = wv.astype(mxu_dtype)
    h = jnp.dot(xv, wv, preferred_element_type=jnp.float32)
    return jnp.maximum(h + b1_ref[...], 0.0)      # (TB, HIDDEN_PAD) f32


def _domain_clf_kernel_lane_dense(x_ref, w1_ref, b1_ref, w2_ref, b2_ref, o_ref,
                                  *, mxu_dtype):
    # x_ref: (TB, 2352)  w1_ref: (2352, 128)  b1/w2: (1, 128)  b2: (1, 1)
    # o_ref: (1, 1, TB)  -- lane-dense output block.
    h = _fc1_relu(x_ref, w1_ref, b1_ref, mxu_dtype)
    # fc2 (N=1) off the MXU: VPU multiply + lane reduction; padded hidden
    # columns are zero in both h and w2 so they contribute nothing.
    z = jnp.sum(h * w2_ref[...], axis=-1)                     # (TB,)
    z = z.reshape(1, 1, -1) + b2_ref[...].reshape(1, 1, 1)    # (1, 1, TB)
    o_ref[...] = jax.nn.sigmoid(z).astype(o_ref.dtype)


def _domain_clf_kernel_basic(x_ref, w1_ref, b1_ref, w2_ref, b2_ref, o_ref,
                             *, mxu_dtype):
    # Conservative variant: o_ref is (TB, 1) (masked stores).
    h = _fc1_relu(x_ref, w1_ref, b1_ref, mxu_dtype)
    z = jnp.sum(h * w2_ref[...], axis=-1, keepdims=True) + b2_ref[...]
    o_ref[...] = jax.nn.sigmoid(z).astype(o_ref.dtype)


def prepare_params(w1, b1, w2, b2, *, stream_dtype=jnp.float32):
    """One-time weight prep, hoisted out of the per-call path.

    Pads hidden 100 -> 128 (zero columns are inert), lays fc2 / biases out as
    row vectors. Weights are stored (in, out): x @ W == x @ W_pt.T.
    """
    pad = HIDDEN_PAD - HIDDEN
    w1p = jnp.pad(w1, ((0, 0), (0, pad))).astype(stream_dtype)              # (2352, 128)
    b1p = jnp.pad(b1.reshape(1, HIDDEN), ((0, 0), (0, pad))).astype(jnp.float32)
    w2p = jnp.pad(w2.reshape(1, HIDDEN), ((0, 0), (0, pad))).astype(jnp.float32)
    b2p = b2.reshape(1, 1).astype(jnp.float32)
    return w1p, b1p, w2p, b2p


def _build_call(batch, tb, stream_dtype, mxu_dtype, optimized):
    n_steps = pl.cdiv(batch, tb)
    itm = jnp.dtype(stream_dtype).itemsize

    cost = pl.CostEstimate(
        flops=2 * batch * IN_FEATURES * HIDDEN_PAD + 4 * batch * HIDDEN_PAD,
        transcendentals=batch,                               # one sigmoid per row
        bytes_accessed=(batch * IN_FEATURES * itm            # x (streamed once)
                        + IN_FEATURES * HIDDEN_PAD * itm     # w1 (read once, resident)
                        + (2 * HIDDEN_PAD + 1) * 4           # b1, w2 row, b2
                        + n_steps * tb * 4),                 # output
    )

    x_bytes = 2 * tb * IN_FEATURES * itm           # double-buffered x tile
    w_bytes = 2 * IN_FEATURES * HIDDEN_PAD * itm   # w1 (budget 2x even if single-buffered)
    vmem_limit = int(max(32 << 20, x_bytes + w_bytes + (8 << 20)))

    x_spec = pl.BlockSpec((tb, IN_FEATURES), lambda i: (i, 0))

    if optimized:
        def resident(shape):  # constant index_map + single-buffered (never re-DMA'd)
            return pl.BlockSpec(shape, lambda i: (0,) * len(shape),
                                pipeline_mode=pl.Buffered(1))
        in_specs = [x_spec,
                    resident((IN_FEATURES, HIDDEN_PAD)),
                    resident((1, HIDDEN_PAD)),
                    resident((1, HIDDEN_PAD)),
                    resident((1, 1))]
        out_shape = jax.ShapeDtypeStruct((n_steps, 1, tb), jnp.float32)
        out_spec = pl.BlockSpec((1, 1, tb), lambda i: (i, 0, 0))
        kernel = functools.partial(_domain_clf_kernel_lane_dense, mxu_dtype=mxu_dtype)
        params = pltpu.CompilerParams(
            dimension_semantics=("parallel",),   # shard batch tiles across TCs (v7x)
            vmem_limit_bytes=vmem_limit,
            # Let XLA fuse the x reshape/convert into the pallas_call operand so
            # bf16 streaming does not materialize an extra HBM copy (under jit).
            allow_input_fusion=[True, False, False, False, False],
        )
    else:
        def resident(shape):
            return pl.BlockSpec(shape, lambda i: (0,) * len(shape))
        in_specs = [x_spec,
                    resident((IN_FEATURES, HIDDEN_PAD)),
                    resident((1, HIDDEN_PAD)),
                    resident((1, HIDDEN_PAD)),
                    resident((1, 1))]
        out_shape = jax.ShapeDtypeStruct((batch, OUT), jnp.float32)
        out_spec = pl.BlockSpec((tb, OUT), lambda i: (i, 0))
        kernel = functools.partial(_domain_clf_kernel_basic, mxu_dtype=mxu_dtype)
        params = pltpu.CompilerParams(
            dimension_semantics=("parallel",),
            vmem_limit_bytes=vmem_limit,
        )

    return pl.pallas_call(kernel, out_shape=out_shape, grid=(n_steps,),
                          in_specs=in_specs, out_specs=out_spec,
                          compiler_params=params, cost_estimate=cost)


def mnist_domain_classifier_prepared(x, w1p, b1p, w2p, b2p, *, tile_b=None,
                                     stream_dtype=jnp.float32, mxu_dtype=None):
    """x: (B, 48, 7, 7). Params from prepare_params(). Returns (B, 1) float32.

    If x is already stored in stream_dtype upstream, the astype is a no-op;
    otherwise, under jax.jit, allow_input_fusion fuses the convert into the
    pallas_call operand so bf16 streaming genuinely halves x HBM traffic.
    """
    batch = x.shape[0]
    # GRL is identity in the forward pass; x.view(-1, 48*7*7).
    x2d = x.reshape(batch, IN_FEATURES).astype(stream_dtype)
    tb = _choose_tile_b(batch, tile_b)

    try:
        call = _build_call(batch, tb, stream_dtype, mxu_dtype, optimized=True)
        out = call(x2d, w1p, b1p, w2p, b2p)          # (n_steps, 1, tb) lane-dense
        return out.reshape(-1)[:batch].reshape(batch, OUT)
    except Exception:
        # Conservative fallback (plain double-buffered specs, (B, 1) output) in
        # case this jax build rejects pl.Buffered(1) or the lane-dense store.
        call = _build_call(batch, tb, stream_dtype, mxu_dtype, optimized=False)
        return call(x2d, w1p, b1p, w2p, b2p)


def mnist_domain_classifier(x, w1, b1, w2, b2, *, tile_b=None,
                            stream_dtype=jnp.float32, mxu_dtype=None):
    """Convenience wrapper (prepares params every call). Prefer prepare_params()
    + mnist_domain_classifier_prepared() so weight prep runs once."""
    params = prepare_params(w1, b1, w2, b2, stream_dtype=stream_dtype)
    return mnist_domain_classifier_prepared(
        x, *params, tile_b=tile_b, stream_dtype=stream_dtype, mxu_dtype=mxu_dtype)


def init_params(key):
    """nn.Linear-style init (uniform +/- 1/sqrt(fan_in)); stored as (in, out)."""
    k1, k2, k3, k4 = jax.random.split(key, 4)
    bound1 = 1.0 / jnp.sqrt(float(IN_FEATURES))
    bound2 = 1.0 / jnp.sqrt(float(HIDDEN))
    w1 = jax.random.uniform(k1, (IN_FEATURES, HIDDEN), jnp.float32, -bound1, bound1)
    b1 = jax.random.uniform(k2, (HIDDEN,), jnp.float32, -bound1, bound1)
    w2 = jax.random.uniform(k3, (HIDDEN, OUT), jnp.float32, -bound2, bound2)
    b2 = jax.random.uniform(k4, (OUT,), jnp.float32, -bound2, bound2)
    return w1, b1, w2, b2


if __name__ == "__main__":
    key = jax.random.PRNGKey(0)
    kx, kx2, kp = jax.random.split(key, 3)

    w1, b1, w2, b2 = init_params(kp)

    def ref_fwd(xx):
        x2d = xx.reshape(xx.shape[0], IN_FEATURES)
        return jax.nn.sigmoid(jnp.maximum(x2d @ w1 + b1, 0.0) @ w2 + b2)

    # One-time weight prep (hoisted out of the per-call path).
    params_f32 = prepare_params(w1, b1, w2, b2, stream_dtype=jnp.float32)

    # 1) Small batch, exact f32 semantics (matches the PyTorch module).
    x = jax.random.normal(kx, (2, 48, 7, 7), jnp.float32)    # NCHW, as in PyTorch
    out = jax.block_until_ready(mnist_domain_classifier_prepared(x, *params_f32))
    assert out.shape == (2, OUT)
    assert jnp.allclose(out, ref_fwd(x), atol=1e-5, rtol=1e-5)

    # 2) Multi-tile grid (B not a multiple of the tile) + lane-dense output path.
    xb = jax.random.normal(kx2, (24, 48, 7, 7), jnp.float32)
    out_b = jax.block_until_ready(
        mnist_domain_classifier_prepared(xb, *params_f32, tile_b=16))
    assert out_b.shape == (24, OUT)
    assert jnp.allclose(out_b, ref_fwd(xb), atol=1e-5, rtol=1e-5)

    # 3) bf16 streaming (f32 accumulation); looser tolerance for the cast.
    params_bf16 = prepare_params(w1, b1, w2, b2, stream_dtype=jnp.bfloat16)
    out_bf16 = jax.block_until_ready(
        mnist_domain_classifier_prepared(x, *params_bf16,
                                         stream_dtype=jnp.bfloat16))
    assert jnp.allclose(out_bf16, ref_fwd(x), atol=3e-2, rtol=3e-2)

    print("KERNEL_OK")
</pallas_src>

<mosaic_0001>
module attributes {stable_mosaic.version = 11 : i64} {
  func.func @_domain_clf_kernel_lane_dense(%arg0: i32, %arg1: memref<2x2352xf32, #tpu.memory_space<vmem>>, %arg2: memref<2352x128xf32, #tpu.memory_space<vmem>>, %arg3: memref<1x128xf32, #tpu.memory_space<vmem>>, %arg4: memref<1x128xf32, #tpu.memory_space<vmem>>, %arg5: memref<1x1xf32, #tpu.memory_space<vmem>>, %arg6: memref<1x1x2xf32, #tpu.memory_space<vmem>>) attributes {dimension_semantics = [#tpu.dimension_semantics<parallel>], iteration_bounds = array<i64: 1>, scalar_prefetch = 0 : i64, scratch_operands = 0 : i64, tpu.core_type = #tpu.core_type<tc>, window_params = [{transform_indices = @transform_0, window_bounds = array<i64: 2, 2352>}, {pipeline_mode = #tpu.pipeline_mode<synchronous>, transform_indices = @transform_1, window_bounds = array<i64: 2352, 128>}, {pipeline_mode = #tpu.pipeline_mode<synchronous>, transform_indices = @transform_2, window_bounds = array<i64: 1, 128>}, {pipeline_mode = #tpu.pipeline_mode<synchronous>, transform_indices = @transform_3, window_bounds = array<i64: 1, 128>}, {pipeline_mode = #tpu.pipeline_mode<synchronous>, transform_indices = @transform_4, window_bounds = array<i64: 1, 1>}, {transform_indices = @transform_5, window_bounds = array<i64: 1, 1, 2>}]} {
    %c0 = arith.constant 0 : index
    %c0_0 = arith.constant 0 : index
    %0 = vector.load %arg1[%c0, %c0_0] : memref<2x2352xf32, #tpu.memory_space<vmem>>, vector<2x2352xf32>
    %c0_1 = arith.constant 0 : index
    %c0_2 = arith.constant 0 : index
    %1 = vector.load %arg2[%c0_1, %c0_2] : memref<2352x128xf32, #tpu.memory_space<vmem>>, vector<2352x128xf32>
    %cst = arith.constant dense<0.000000e+00> : vector<2x128xf32>
    %2 = tpu.matmul %0, %1, %cst {dimension_numbers = #tpu.dot_dimension_numbers<[1], [0], [0], [1], [0, 0, 1, 1], [], []>} : vector<2x2352xf32>, vector<2352x128xf32>, vector<2x128xf32> -> vector<2x128xf32>
    %c0_3 = arith.constant 0 : index
    %c0_4 = arith.constant 0 : index
    %3 = vector.load %arg3[%c0_3, %c0_4] : memref<1x128xf32, #tpu.memory_space<vmem>>, vector<1x128xf32>
    %4 = vector.broadcast %3 : vector<1x128xf32> to vector<2x128xf32>
    %5 = arith.addf %2, %4 : vector<2x128xf32>
    %cst_5 = arith.constant 0.000000e+00 : f32
    %6 = vector.broadcast %cst_5 : f32 to vector<2x128xf32>
    %7 = arith.maximumf %5, %6 : vector<2x128xf32>
    %c0_6 = arith.constant 0 : index
    %c0_7 = arith.constant 0 : index
    %8 = vector.load %arg4[%c0_6, %c0_7] : memref<1x128xf32, #tpu.memory_space<vmem>>, vector<1x128xf32>
    %9 = vector.broadcast %8 : vector<1x128xf32> to vector<2x128xf32>
    %10 = arith.mulf %7, %9 : vector<2x128xf32>
    %cst_8 = arith.constant dense<0.000000e+00> : vector<2xf32>
    %11 = vector.multi_reduction <add>, %10, %cst_8 [1] : vector<2x128xf32> to vector<2xf32>
    %12 = vector.shape_cast %11 : vector<2xf32> to vector<1x1x2xf32>
    %c0_9 = arith.constant 0 : index
    %c0_10 = arith.constant 0 : index
    %13 = vector.load %arg5[%c0_9, %c0_10] : memref<1x1xf32, #tpu.memory_space<vmem>>, vector<1x1xf32>
    %14 = vector.shape_cast %13 : vector<1x1xf32> to vector<1x1x1xf32>
    %15 = vector.broadcast %14 : vector<1x1x1xf32> to vector<1x1x2xf32>
    %16 = arith.addf %12, %15 : vector<1x1x2xf32>
    %17 = arith.negf %16 : vector<1x1x2xf32>
    %18 = math.exp %17 : vector<1x1x2xf32>
    %cst_11 = arith.constant 1.000000e+00 : f32
    %19 = vector.broadcast %cst_11 : f32 to vector<1x1x2xf32>
    %20 = arith.addf %19, %18 : vector<1x1x2xf32>
    %21 = arith.divf %19, %20 : vector<1x1x2xf32>
    %c0_12 = arith.constant 0 : index
    %c0_13 = arith.constant 0 : index
    %c0_14 = arith.constant 0 : index
    %22 = vector.load %arg6[%c0_12, %c0_13, %c0_14] : memref<1x1x2xf32, #tpu.memory_space<vmem>>, vector<1x1x2xf32>
    tpu.vector_store %arg6[%c0_12, %c0_13, %c0_14], %21 {strides = array<i32>} : memref<1x1x2xf32, #tpu.memory_space<vmem>>, vector<1x1x2xf32>,
    return
  }
  func.func @transform_0(%arg0: i32) -> (i32, i32) {
    %c0_i32 = arith.constant 0 : i32
    %c0_i32_0 = arith.constant 0 : i32
    return %arg0, %c0_i32 : i32, i32
  }
  func.func @transform_1(%arg0: i32) -> (i32, i32) {
    %c0_i32 = arith.constant 0 : i32
    %c0_i32_0 = arith.constant 0 : i32
    %c0_i32_1 = arith.constant 0 : i32
    return %c0_i32, %c0_i32_0 : i32, i32
  }
  func.func @transform_2(%arg0: i32) -> (i32, i32) {
    %c0_i32 = arith.constant 0 : i32
    %c0_i32_0 = arith.constant 0 : i32
    %c0_i32_1 = arith.constant 0 : i32
    return %c0_i32, %c0_i32_0 : i32, i32
  }
  func.func @transform_3(%arg0: i32) -> (i32, i32) {
    %c0_i32 = arith.constant 0 : i32
    %c0_i32_0 = arith.constant 0 : i32
    %c0_i32_1 = arith.constant 0 : i32
    return %c0_i32, %c0_i32_0 : i32, i32
  }
  func.func @transform_4(%arg0: i32) -> (i32, i32) {
    %c0_i32 = arith.constant 0 : i32
    %c0_i32_0 = arith.constant 0 : i32
    %c0_i32_1 = arith.constant 0 : i32
    return %c0_i32, %c0_i32_0 : i32, i32
  }
  func.func @transform_5(%arg0: i32) -> (i32, i32, i32) {
    %c0_i32 = arith.constant 0 : i32
    %c0_i32_0 = arith.constant 0 : i32
    %c0_i32_1 = arith.constant 0 : i32
    return %arg0, %c0_i32, %c0_i32_0 : i32, i32, i32
  }
}

module attributes {stable_mosaic.version = 11 : i64} {
  func.func @_domain_clf_kernel_basic(%arg0: i32, %arg1: memref<2x2352xf32, #tpu.memory_space<vmem>>, %arg2: memref<2352x128xf32, #tpu.memory_space<vmem>>, %arg3: memref<1x128xf32, #tpu.memory_space<vmem>>, %arg4: memref<1x128xf32, #tpu.memory_space<vmem>>, %arg5: memref<1x1xf32, #tpu.memory_space<vmem>>, %arg6: memref<2x1xf32, #tpu.memory_space<vmem>>) attributes {dimension_semantics = [#tpu.dimension_semantics<parallel>], iteration_bounds = array<i64: 1>, scalar_prefetch = 0 : i64, scratch_operands = 0 : i64, tpu.core_type = #tpu.core_type<tc>, window_params = [{transform_indices = @transform_0, window_bounds = array<i64: 2, 2352>}, {pipeline_mode = #tpu.pipeline_mode<synchronous>, transform_indices = @transform_1, window_bounds = array<i64: 2352, 128>}, {pipeline_mode = #tpu.pipeline_mode<synchronous>, transform_indices = @transform_2, window_bounds = array<i64: 1, 128>}, {pipeline_mode = #tpu.pipeline_mode<synchronous>, transform_indices = @transform_3, window_bounds = array<i64: 1, 128>}, {pipeline_mode = #tpu.pipeline_mode<synchronous>, transform_indices = @transform_4, window_bounds = array<i64: 1, 1>}, {transform_indices = @transform_5, window_bounds = array<i64: 2, 1>}]} {
    %c0 = arith.constant 0 : index
    %c0_0 = arith.constant 0 : index
    %0 = vector.load %arg1[%c0, %c0_0] : memref<2x2352xf32, #tpu.memory_space<vmem>>, vector<2x2352xf32>
    %c0_1 = arith.constant 0 : index
    %c0_2 = arith.constant 0 : index
    %1 = vector.load %arg2[%c0_1, %c0_2] : memref<2352x128xf32, #tpu.memory_space<vmem>>, vector<2352x128xf32>
    %cst = arith.constant dense<0.000000e+00> : vector<2x128xf32>
    %2 = tpu.matmul %0, %1, %cst {dimension_numbers = #tpu.dot_dimension_numbers<[1], [0], [0], [1], [0, 0, 1, 1], [], []>} : vector<2x2352xf32>, vector<2352x128xf32>, vector<2x128xf32> -> vector<2x128xf32>
    %c0_3 = arith.constant 0 : index
    %c0_4 = arith.constant 0 : index
    %3 = vector.load %arg3[%c0_3, %c0_4] : memref<1x128xf32, #tpu.memory_space<vmem>>, vector<1x128xf32>
    %4 = vector.broadcast %3 : vector<1x128xf32> to vector<2x128xf32>
    %5 = arith.addf %2, %4 : vector<2x128xf32>
    %cst_5 = arith.constant 0.000000e+00 : f32
    %6 = vector.broadcast %cst_5 : f32 to vector<2x128xf32>
    %7 = arith.maximumf %5, %6 : vector<2x128xf32>
    %c0_6 = arith.constant 0 : index
    %c0_7 = arith.constant 0 : index
    %8 = vector.load %arg4[%c0_6, %c0_7] : memref<1x128xf32, #tpu.memory_space<vmem>>, vector<1x128xf32>
    %9 = vector.broadcast %8 : vector<1x128xf32> to vector<2x128xf32>
    %10 = arith.mulf %7, %9 : vector<2x128xf32>
    %cst_8 = arith.constant dense<0.000000e+00> : vector<2xf32>
    %11 = vector.multi_reduction <add>, %10, %cst_8 [1] : vector<2x128xf32> to vector<2xf32>
    %12 = vector.shape_cast %11 : vector<2xf32> to vector<2x1xf32>
    %c0_9 = arith.constant 0 : index
    %c0_10 = arith.constant 0 : index
    %13 = vector.load %arg5[%c0_9, %c0_10] : memref<1x1xf32, #tpu.memory_space<vmem>>, vector<1x1xf32>
    %14 = vector.broadcast %13 : vector<1x1xf32> to vector<2x1xf32>
    %15 = arith.addf %12, %14 : vector<2x1xf32>
    %16 = arith.negf %15 : vector<2x1xf32>
    %17 = math.exp %16 : vector<2x1xf32>
    %cst_11 = arith.constant 1.000000e+00 : f32
    %18 = vector.broadcast %cst_11 : f32 to vector<2x1xf32>
    %19 = arith.addf %18, %17 : vector<2x1xf32>
    %20 = arith.divf %18, %19 : vector<2x1xf32>
    %c0_12 = arith.constant 0 : index
    %c0_13 = arith.constant 0 : index
    %21 = vector.load %arg6[%c0_12, %c0_13] : memref<2x1xf32, #tpu.memory_space<vmem>>, vector<2x1xf32>
    tpu.vector_store %arg6[%c0_12, %c0_13], %20 {strides = array<i32>} : memref<2x1xf32, #tpu.memory_space<vmem>>, vector<2x1xf32>,
    return
  }
  func.func @transform_0(%arg0: i32) -> (i32, i32) {
    %c0_i32 = arith.constant 0 : i32
    %c0_i32_0 = arith.constant 0 : i32
    return %arg0, %c0_i32 : i32, i32
  }
  func.func @transform_1(%arg0: i32) -> (i32, i32) {
    %c0_i32 = arith.constant 0 : i32
    %c0_i32_0 = arith.constant 0 : i32
    %c0_i32_1 = arith.constant 0 : i32
    return %c0_i32, %c0_i32_0 : i32, i32
  }
  func.func @transform_2(%arg0: i32) -> (i32, i32) {
    %c0_i32 = arith.constant 0 : i32
    %c0_i32_0 = arith.constant 0 : i32
    %c0_i32_1 = arith.constant 0 : i32
    return %c0_i32, %c0_i32_0 : i32, i32
  }
  func.func @transform_3(%arg0: i32) -> (i32, i32) {
    %c0_i32 = arith.constant 0 : i32
    %c0_i32_0 = arith.constant 0 : i32
    %c0_i32_1 = arith.constant 0 : i32
    return %c0_i32, %c0_i32_0 : i32, i32
  }
  func.func @transform_4(%arg0: i32) -> (i32, i32) {
    %c0_i32 = arith.constant 0 : i32
    %c0_i32_0 = arith.constant 0 : i32
    %c0_i32_1 = arith.constant 0 : i32
    return %c0_i32, %c0_i32_0 : i32, i32
  }
  func.func @transform_5(%arg0: i32) -> (i32, i32) {
    %c0_i32 = arith.constant 0 : i32
    %c0_i32_0 = arith.constant 0 : i32
    return %arg0, %c0_i32 : i32, i32
  }
}

</mosaic_0001>

<bundles_post_ra>
// kernel: tpu_custom_call.1
= control target key start
LH: loop header
LB: loop body
LE: loop exit
PB: predicated region body
PF: predicated region fallthrough
CT: control target
= control target key end

     0   :  { %s1111_s0 = inlined_call_operand.hbm [shape: f32[2,2352], index: 0, kind: input, shape index: {}]   ;;  %s1112_s1 = inlined_call_operand.hbm [shape: f32[2352,128], index: 1, kind: input, shape index: {}]   ;;  %s1113_s2 = inlined_call_operand.hbm [shape: f32[1,128], index: 2, kind: input, shape index: {}]   ;;  %s1114_s3 = inlined_call_operand.hbm [shape: f32[1,128], index: 3, kind: input, shape index: {}]   ;;  %s1115_s4 = inlined_call_operand.<no memory space> [shape: f32[1,1], index: 4, kind: input, shape index: {}]   ;;  %s1116_s5 = inlined_call_operand.hbm [shape: f32[1,1,2], index: 5, kind: output, shape index: {}]  }
   0x1   :  { %v10_v0 = vstv %s1115_s4 }
   0x2   :  { %11 = vst [vmem:[#allocation2] sm:$0x1] %v10_v0 }
   0x3   :  { %12 = vsyncpa [#allocation4], 0 }
   0x4   :  { %13 = vsyncpa [#allocation7], 0 }
   0x5   :  { %14 = vsyncpa [#allocation10], 0  ;;  %s31_s22 = sshll.u32 %s1112_s1, 4  ;;  %s32_s22 = int_to_ptr.hbm [resolvable:$true] %s31_s22 }
   0x6   :  { %15 = vsyncpa [#allocation5], 0  ;;  %s1022_s23 = smov [#allocation6]   ;;  %s21_s27 = sshll.u32 %s1111_s0, 4  ;;  %s22_s27 = int_to_ptr.hbm [resolvable:$true] %s21_s27 }
   0x7   :  { %s33_s24 = sshll.u32 %s1022_s23, 4  ;;  %s1023_s28 = smov 128   ;;  %s34_s24 = int_to_ptr.vmem [resolvable:$true] %s33_s24 }
   0x8   :  { %s1024_s29 = smov 8   ;;  %s1025_s4 = smov [#allocation3]  }
   0x9   :  { %39 = dma.hbm_to_vmem [thread:$0]  %s32_s22, 37632, %s34_s24, [#allocation7], %s1023_s28, %s1023_s28, %s1024_s29  }
   0xa   :  { %s23_s30 = sshll.u32 %s1025_s4, 4  ;;  %s45_s8 = sshll.u32 %s1113_s2, 4  ;;  %s24_s30 = int_to_ptr.vmem [resolvable:$true] %s23_s30  ;;  %s46_s8 = int_to_ptr.hbm [resolvable:$true] %s45_s8 }
   0xb   :  { %26 = dma.hbm_to_vmem [thread:$0]  %s22_s27, 608, %s24_s30, [#allocation4]  }
   0xc   :  { %s56_s10 = sshll.u32 %s1114_s3, 4  ;;  %s1026_s11 = smov [#allocation8]   ;;  %s57_s10 = int_to_ptr.hbm [resolvable:$true] %s56_s10 }
   0xd   :  { %s47_s12 = sshll.u32 %s1026_s11, 4  ;;  %s1027_s0 = smov [#allocation9]   ;;  %s48_s12 = int_to_ptr.vmem [resolvable:$true] %s47_s12 }
   0xe   :  { %50 = dma.hbm_to_vmem [thread:$0]  %s46_s8, 16, %s48_s12, [#allocation7]  }
   0xf   :  { %s58_s13 = sshll.u32 %s1027_s0, 4  ;;  %s59_s13 = int_to_ptr.vmem [resolvable:$true] %s58_s13 }
  0x10   :  { %61 = dma.hbm_to_vmem [thread:$0]  %s57_s10, 16, %s59_s13, [#allocation10]  }
  0x11   :  { %1014 = dma.done.wait [#allocation4], 608  }
  0x12   :  { %1015 = vsyncadd [#allocation4], 4294966688 }
  0x13   :  { %1016 = dma.done.wait [#allocation7], 37648  }
  0x14   :  { %1017 = vsyncadd [#allocation7], 4294929648 }
  0x15   :  { %1018 = dma.done.wait [#allocation10], 16  }
  0x16   :  { %1019 = vsyncadd [#allocation10], 4294967280  ;;  %v100_v1 = vld [vmem:[#allocation6 + $0x78] sm:$0xff]  ;;  %v99_v3 = vld [vmem:[#allocation6 + $0x70] sm:$0xff]  ;;  %vm431_vm0 = vcmask 392192   ;;  %vm820_vm1 = vcmask 1041408  }
  0x17   :  { %v132_v2 = vld [vmem:[#allocation6 + $0x178] sm:$0xff]  ;;  %434 = vmatpush.msra.mxu0 %v100_v1  ;;  %v131_v5 = vld [vmem:[#allocation6 + $0x170] sm:$0xff]  ;;  %v98_v7 = vld [vmem:[#allocation6 + $0x68] sm:$0xff]  ;;  %s1029_s2 = smov [#allocation11]   ;;  %s865_s16 = sshll.u32 %s1116_s5, 4  ;;  %vm856_vm6 = vcmask 8192   ;;  %s866_s16 = int_to_ptr.hbm [resolvable:$true] %s865_s16 }
  0x18   :  { %474 = vmatpush.msra.mxu2 %v132_v2  ;;  %v116_v4 = vld [vmem:[#allocation6 + $0xf8] sm:$0xff]  ;;  %v115_v8 = vld [vmem:[#allocation6 + $0xf0] sm:$0xff]  ;;  %v130_v9 = vld [vmem:[#allocation6 + $0x168] sm:$0xff]  ;;  %s863_s3 = sshll.u32 %s1029_s2, 4  ;;  %s864_s3 = int_to_ptr.vmem [resolvable:$true] %s863_s3 }
  0x19   :  { %v148_v6 = vld [vmem:[#allocation6 + $0x1f8] sm:$0xff]  ;;  %454 = vmatpush.msra.mxu1 %v116_v4  ;;  %435 = vmatpush.msra.mxu0 %v99_v3  ;;  %v147_v10 = vld [vmem:[#allocation6 + $0x1f0] sm:$0xff]  ;;  %v114_v11 = vld [vmem:[#allocation6 + $0xe8] sm:$0xff] }
  0x1a   :  { %494 = vmatpush.msra.mxu3 %v148_v6  ;;  %475 = vmatpush.msra.mxu2 %v131_v5  ;;  %v97_v12 = vld [vmem:[#allocation6 + $0x60] sm:$0xff]  ;;  %v146_v14 = vld [vmem:[#allocation6 + $0x1e8] sm:$0xff]  ;;  %v96_v17 = vld [vmem:[#allocation6 + $0x58] sm:$0xff] }
  0x1b   :  { %455 = vmatpush.msra.mxu1 %v115_v8  ;;  %v129_v13 = vld [vmem:[#allocation6 + $0x160] sm:$0xff]  ;;  %436 = vmatpush.msra.mxu0 %v98_v7  ;;  %v128_v18 = vld [vmem:[#allocation6 + $0x158] sm:$0xff]  ;;  %v95_v21 = vld [vmem:[#allocation6 + $0x50] sm:$0xff] }
  0x1c   :  { %495 = vmatpush.msra.mxu3 %v147_v10  ;;  %476 = vmatpush.msra.mxu2 %v130_v9  ;;  %v113_v15 = vld [vmem:[#allocation6 + $0xe0] sm:$0xff]  ;;  %v112_v19 = vld [vmem:[#allocation6 + $0xd8] sm:$0xff]  ;;  %v127_v22 = vld [vmem:[#allocation6 + $0x150] sm:$0xff] }
  0x1d   :  { %v145_v16 = vld [vmem:[#allocation6 + $0x1e0] sm:$0xff]  ;;  %456 = vmatpush.msra.mxu1 %v114_v11  ;;  %437 = vmatpush.msra.mxu0 %v97_v12  ;;  %v144_v20 = vld [vmem:[#allocation6 + $0x1d8] sm:$0xff]  ;;  %v111_v23 = vld [vmem:[#allocation6 + $0xd0] sm:$0xff] }
  0x1e   :  { %496 = vmatpush.msra.mxu3 %v146_v14  ;;  %477 = vmatpush.msra.mxu2 %v129_v13  ;;  %v143_v24 = vld [vmem:[#allocation6 + $0x1d0] sm:$0xff]  ;;  %v94_v25 = vld [vmem:[#allocation6 + $0x48] sm:$0xff]  ;;  %v93_v29 = vld [vmem:[#allocation6 + $0x40] sm:$0xff] }
  0x1f   :  { %457 = vmatpush.msra.mxu1 %v113_v15  ;;  %438 = vmatpush.msra.mxu0 %v96_v17  ;;  %v126_v26 = vld [vmem:[#allocation6 + $0x148] sm:$0xff]  ;;  %v125_v30 = vld [vmem:[#allocation6 + $0x140] sm:$0xff]  ;;  %v92_v33 = vld [vmem:[#allocation6 + $0x38] sm:$0xff] }
  0x20   :  { %497 = vmatpush.msra.mxu3 %v145_v16  ;;  %478 = vmatpush.msra.mxu2 %v128_v18  ;;  %v110_v27 = vld [vmem:[#allocation6 + $0xc8] sm:$0xff]  ;;  %v109_v31 = vld [vmem:[#allocation6 + $0xc0] sm:$0xff]  ;;  %v124_v34 = vld [vmem:[#allocation6 + $0x138] sm:$0xff] }
  0x21   :  { %458 = vmatpush.msra.mxu1 %v112_v19  ;;  %439 = vmatpush.msra.mxu0 %v95_v21  ;;  %v142_v28 = vld [vmem:[#allocation6 + $0x1c8] sm:$0xff]  ;;  %v141_v32 = vld [vmem:[#allocation6 + $0x1c0] sm:$0xff]  ;;  %v108_v35 = vld [vmem:[#allocation6 + $0xb8] sm:$0xff] }
  0x22   :  { %498 = vmatpush.msra.mxu3 %v144_v20  ;;  %479 = vmatpush.msra.mxu2 %v127_v22  ;;  %v140_v36 = vld [vmem:[#allocation6 + $0x1b8] sm:$0xff]  ;;  %v91_v37 = vld [vmem:[#allocation6 + $0x30] sm:$0xff]  ;;  %v90_v41 = vld [vmem:[#allocation6 + $0x28] sm:$0xff] }
  0x23   :  { %459 = vmatpush.msra.mxu1 %v111_v23  ;;  %440 = vmatpush.msra.mxu0 %v94_v25  ;;  %v123_v38 = vld [vmem:[#allocation6 + $0x130] sm:$0xff]  ;;  %v122_v42 = vld [vmem:[#allocation6 + $0x128] sm:$0xff]  ;;  %v89_v45 = vld [vmem:[#allocation6 + $0x20] sm:$0xff] }
  0x24   :  { %499 = vmatpush.msra.mxu3 %v143_v24  ;;  %480 = vmatpush.msra.mxu2 %v126_v26  ;;  %v107_v39 = vld [vmem:[#allocation6 + $0xb0] sm:$0xff]  ;;  %v106_v43 = vld [vmem:[#allocation6 + $0xa8] sm:$0xff]  ;;  %v121_v46 = vld [vmem:[#allocation6 + $0x120] sm:$0xff] }
  0x25   :  { %460 = vmatpush.msra.mxu1 %v110_v27  ;;  %441 = vmatpush.msra.mxu0 %v93_v29  ;;  %v139_v40 = vld [vmem:[#allocation6 + $0x1b0] sm:$0xff]  ;;  %v138_v44 = vld [vmem:[#allocation6 + $0x1a8] sm:$0xff]  ;;  %v105_v47 = vld [vmem:[#allocation6 + $0xa0] sm:$0xff] }
  0x26   :  { %500 = vmatpush.msra.mxu3 %v142_v28  ;;  %481 = vmatpush.msra.mxu2 %v125_v30  ;;  %v137_v48 = vld [vmem:[#allocation6 + $0x1a0] sm:$0xff]  ;;  %v88_v49 = vld [vmem:[#allocation6 + $0x18] sm:$0xff]  ;;  %v87_v53 = vld [vmem:[#allocation6 + $0x10] sm:$0xff] }
  0x27   :  { %461 = vmatpush.msra.mxu1 %v109_v31  ;;  %442 = vmatpush.msra.mxu0 %v92_v33  ;;  %v120_v50 = vld [vmem:[#allocation6 + $0x118] sm:$0xff]  ;;  %v119_v54 = vld [vmem:[#allocation6 + $0x110] sm:$0xff]  ;;  %v86_v57 = vld [vmem:[#allocation6 + $0x8] sm:$0xff] }
  0x28   :  { %501 = vmatpush.msra.mxu3 %v141_v32  ;;  %482 = vmatpush.msra.mxu2 %v124_v34  ;;  %v104_v51 = vld [vmem:[#allocation6 + $0x98] sm:$0xff]  ;;  %v103_v55 = vld [vmem:[#allocation6 + $0x90] sm:$0xff]  ;;  %v118_v58 = vld [vmem:[#allocation6 + $0x108] sm:$0xff] }
  0x29   :  { %462 = vmatpush.msra.mxu1 %v108_v35  ;;  %443 = vmatpush.msra.mxu0 %v91_v37  ;;  %v136_v52 = vld [vmem:[#allocation6 + $0x198] sm:$0xff]  ;;  %v135_v56 = vld [vmem:[#allocation6 + $0x190] sm:$0xff]  ;;  %v102_v59 = vld [vmem:[#allocation6 + $0x88] sm:$0xff] }
  0x2a   :  { %502 = vmatpush.msra.mxu3 %v140_v36  ;;  %483 = vmatpush.msra.mxu2 %v123_v38  ;;  %v134_v60 = vld [vmem:[#allocation6 + $0x188] sm:$0xff]  ;;  %v85_v61 = vld [vmem:[#allocation6] sm:$0xff]  ;;  %v164_v63 = vld [vmem:[#allocation6 + $0x278] sm:$0xff] }
  0x2b   :  { %463 = vmatpush.msra.mxu1 %v107_v39  ;;  %444 = vmatpush.msra.mxu0 %v90_v41  ;;  %v117_v62 = vld [vmem:[#allocation6 + $0x100] sm:$0xff]  ;;  %v196_v0 = vld [vmem:[#allocation6 + $0x378] sm:$0xff]  ;;  %v163_v3 = vld [vmem:[#allocation6 + $0x270] sm:$0xff] }
  0x2c   :  { %503 = vmatpush.msra.mxu3 %v139_v40  ;;  %484 = vmatpush.msra.mxu2 %v122_v42  ;;  %v101_v1 = vld [vmem:[#allocation6 + $0x80] sm:$0xff]  ;;  %v180_v4 = vld [vmem:[#allocation6 + $0x2f8] sm:$0xff]  ;;  %v195_v5 = vld [vmem:[#allocation6 + $0x370] sm:$0xff] }
  0x2d   :  { %464 = vmatpush.msra.mxu1 %v106_v43  ;;  %445 = vmatpush.msra.mxu0 %v89_v45  ;;  %v133_v2 = vld [vmem:[#allocation6 + $0x180] sm:$0xff]  ;;  %v212_v6 = vld [vmem:[#allocation6 + $0x3f8] sm:$0xff]  ;;  %v162_v7 = vld [vmem:[#allocation6 + $0x268] sm:$0xff] }
  0x2e   :  { %504 = vmatpush.msra.mxu3 %v138_v44  ;;  %485 = vmatpush.msra.mxu2 %v121_v46  ;;  %v179_v8 = vld [vmem:[#allocation6 + $0x2f0] sm:$0xff]  ;;  %v194_v9 = vld [vmem:[#allocation6 + $0x368] sm:$0xff]  ;;  %v161_v11 = vld [vmem:[#allocation6 + $0x260] sm:$0xff] }
  0x2f   :  { %465 = vmatpush.msra.mxu1 %v105_v47  ;;  %446 = vmatpush.msra.mxu0 %v88_v49  ;;  %v211_v10 = vld [vmem:[#allocation6 + $0x3f0] sm:$0xff]  ;;  %v178_v12 = vld [vmem:[#allocation6 + $0x2e8] sm:$0xff]  ;;  %v193_v13 = vld [vmem:[#allocation6 + $0x360] sm:$0xff] }
  0x30   :  { %505 = vmatpush.msra.mxu3 %v137_v48  ;;  %486 = vmatpush.msra.mxu2 %v120_v50  ;;  %v210_v14 = vld [vmem:[#allocation6 + $0x3e8] sm:$0xff]  ;;  %v160_v15 = vld [vmem:[#allocation6 + $0x258] sm:$0xff]  ;;  %v177_v16 = vld [vmem:[#allocation6 + $0x2e0] sm:$0xff] }
  0x31   :  { %466 = vmatpush.msra.mxu1 %v104_v51  ;;  %447 = vmatpush.msra.mxu0 %v87_v53  ;;  %v192_v17 = vld [vmem:[#allocation6 + $0x358] sm:$0xff]  ;;  %v209_v18 = vld [vmem:[#allocation6 + $0x3e0] sm:$0xff]  ;;  %v159_v19 = vld [vmem:[#allocation6 + $0x250] sm:$0xff] }
  0x32   :  { %506 = vmatpush.msra.mxu3 %v136_v52  ;;  %487 = vmatpush.msra.mxu2 %v119_v54  ;;  %v176_v20 = vld [vmem:[#allocation6 + $0x2d8] sm:$0xff]  ;;  %v191_v21 = vld [vmem:[#allocation6 + $0x350] sm:$0xff]  ;;  %v158_v24 = vld [vmem:[#allocation6 + $0x248] sm:$0xff] }
  0x33   :  { %467 = vmatpush.msra.mxu1 %v103_v55  ;;  %448 = vmatpush.msra.mxu0 %v86_v57  ;;  %v208_v22 = vld [vmem:[#allocation6 + $0x3d8] sm:$0xff]  ;;  %v175_v25 = vld [vmem:[#allocation6 + $0x2d0] sm:$0xff]  ;;  %v190_v26 = vld [vmem:[#allocation6 + $0x348] sm:$0xff] }
  0x34   :  { %507 = vmatpush.msra.mxu3 %v135_v56  ;;  %488 = vmatpush.msra.mxu2 %v118_v58  ;;  %v80_v23 = vld [vmem:[#allocation3] sm:$0xff]  ;;  %v207_v27 = vld [vmem:[#allocation6 + $0x3d0] sm:$0xff]  ;;  %v174_v29 = vld [vmem:[#allocation6 + $0x2c8] sm:$0xff] }
  0x35   :  { %468 = vmatpush.msra.mxu1 %v102_v59  ;;  %449 = vmatpush.msra.mxu0 %v85_v61  ;;  %388 = vst [vmem:[#allocation1] ss:$4 sm:$0xff] %v80_v23  ;;  %v157_v28 = vld [vmem:[#allocation6 + $0x240] sm:$0xff]  ;;  %v206_v31 = vld [vmem:[#allocation6 + $0x3c8] sm:$0xff]  ;;  %v156_v32 = vld [vmem:[#allocation6 + $0x238] sm:$0xff] }
  0x36   :  { %508 = vmatpush.msra.mxu3 %v134_v60  ;;  %489 = vmatpush.msra.mxu2 %v117_v62  ;;  %v189_v30 = vld [vmem:[#allocation6 + $0x340] sm:$0xff]  ;;  %v188_v34 = vld [vmem:[#allocation6 + $0x338] sm:$0xff]  ;;  %v155_v36 = vld [vmem:[#allocation6 + $0x230] sm:$0xff] }
  0x37   :  { %514 = vmatpush.msrb.mxu0 %v164_v63  ;;  %469 = vmatpush.msra.mxu1 %v101_v1  ;;  %v173_v33 = vld [vmem:[#allocation6 + $0x2c0] sm:$0xff]  ;;  %v172_v37 = vld [vmem:[#allocation6 + $0x2b8] sm:$0xff]  ;;  %v187_v38 = vld [vmem:[#allocation6 + $0x330] sm:$0xff] }
  0x38   :  { %554 = vmatpush.msrb.mxu2 %v196_v0  ;;  %509 = vmatpush.msra.mxu3 %v133_v2  ;;  %v205_v35 = vld [vmem:[#allocation6 + $0x3c0] sm:$0xff]  ;;  %v204_v39 = vld [vmem:[#allocation6 + $0x3b8] sm:$0xff]  ;;  %v154_v41 = vld [vmem:[#allocation6 + $0x228] sm:$0xff] }
  0x39   :  { %515 = vmatpush.msrb.mxu0 %v163_v3  ;;  %534 = vmatpush.msrb.mxu1 %v180_v4  ;;  %v81_v40 = vld [vmem:[#allocation3 + $0x8] sm:$0xff]  ;;  %v171_v42 = vld [vmem:[#allocation6 + $0x2b0] sm:$0xff]  ;;  %v152_v54 = vld [vmem:[#allocation6 + $0x218] sm:$0xff] }
  0x3a   :  { %555 = vmatpush.msrb.mxu2 %v195_v5  ;;  %574 = vmatpush.msrb.mxu3 %v212_v6  ;;  %v82_v43 = vld [vmem:[#allocation3 + $0x10] sm:$0xff]  ;;  %390 = vst [vmem:[#allocation1 + $0x20] ss:$4 sm:$0xff] %v81_v40  ;;  %v153_v50 = vld [vmem:[#allocation6 + $0x220] sm:$0xff]  ;;  %v184_v56 = vld [vmem:[#allocation6 + $0x318] sm:$0xff] }
  0x3b   :  { %516 = vmatpush.msrb.mxu0 %v162_v7  ;;  %535 = vmatpush.msrb.mxu1 %v179_v8  ;;  %v186_v44 = vld [vmem:[#allocation6 + $0x328] sm:$0xff]  ;;  %v203_v49 = vld [vmem:[#allocation6 + $0x3b0] sm:$0xff]  ;;  %v185_v52 = vld [vmem:[#allocation6 + $0x320] sm:$0xff] }
  0x3c   :  { %556 = vmatpush.msrb.mxu2 %v194_v9  ;;  %575 = vmatpush.msrb.mxu3 %v211_v10  ;;  %v393_v45 = vld.sshfl [vmem:[#allocation1 + $0x10] sm:$0xff pattern:$0x73625140]  ;;  %v1075_v46 = vld.sshfl [vmem:[#allocation1] sm:$0xff pattern:$0x73625140] }
  0x3d   :  { %517 = vmatpush.msrb.mxu0 %v161_v11  ;;  %536 = vmatpush.msrb.mxu1 %v178_v12  ;;  %v1077_v47 = vld.sshfl [vmem:[#allocation1 + $0x18] sm:$0xff pattern:$0x73625140]  ;;  %v1079_v48 = vld.sshfl [vmem:[#allocation1 + $0x8] sm:$0xff pattern:$0x73625140] }
  0x3e   :  { %557 = vmatpush.msrb.mxu2 %v193_v13  ;;  %576 = vmatpush.msrb.mxu3 %v210_v14  ;;  %v170_v51 = vld [vmem:[#allocation6 + $0x2a8] sm:$0xff]  ;;  %399 = vst [vmem:[#allocation1] ss:$4 sm:$0xff] %v82_v43  ;;  %v169_v55 = vld [vmem:[#allocation6 + $0x2a0] sm:$0xff]  ;;  %v151_v58 = vld [vmem:[#allocation6 + $0x210] sm:$0xff] }
  0x3f   :  { %518 = vmatpush.msrb.mxu0 %v160_v15  ;;  %537 = vmatpush.msrb.mxu1 %v177_v16  ;;  %v202_v53 = vld [vmem:[#allocation6 + $0x3a8] sm:$0xff]  ;;  %v201_v57 = vld [vmem:[#allocation6 + $0x3a0] sm:$0xff]  ;;  %v168_v59 = vld [vmem:[#allocation6 + $0x298] sm:$0xff] }
  0x40   :  { %558 = vmatpush.msrb.mxu2 %v192_v17  ;;  %577 = vmatpush.msrb.mxu3 %v209_v18  ;;  %v83_v60 = vld [vmem:[#allocation3 + $0x18] sm:$0xff]  ;;  %v150_v3 = vld [vmem:[#allocation6 + $0x208] sm:$0xff]  ;;  %v149_v7 = vld [vmem:[#allocation6 + $0x200] sm:$0xff] }
  0x41   :  { %519 = vmatpush.msrb.mxu0 %v159_v19  ;;  %538 = vmatpush.msrb.mxu1 %v176_v20  ;;  %v1081_v61 = vld.sshfl [vmem:[#allocation1 + $0x30] sm:$0xff pattern:$0x73625140]  ;;  %v1083_v62 = vld.sshfl [vmem:[#allocation1 + $0x20] sm:$0xff pattern:$0x73625140] }
  0x42   :  { %559 = vmatpush.msrb.mxu2 %v191_v21  ;;  %578 = vmatpush.msrb.mxu3 %v208_v22  ;;  %v1085_v63 = vld.sshfl [vmem:[#allocation1 + $0x38] sm:$0xff pattern:$0x73625140]  ;;  %v1087_v0 = vld.sshfl [vmem:[#allocation1 + $0x28] sm:$0xff pattern:$0x73625140] }
  0x43   :  { %520 = vmatpush.msrb.mxu0 %v158_v24  ;;  %539 = vmatpush.msrb.mxu1 %v175_v25  ;;  %v183_v1 = vld [vmem:[#allocation6 + $0x310] sm:$0xff]  ;;  %v200_v2 = vld [vmem:[#allocation6 + $0x398] sm:$0xff]  ;;  %400 = vst [vmem:[#allocation1 + $0x20] ss:$4 sm:$0xff] %v83_v60  ;;  %v182_v5 = vld [vmem:[#allocation6 + $0x308] sm:$0xff] }
  0x44   :  { %560 = vmatpush.msrb.mxu2 %v190_v26  ;;  %579 = vmatpush.msrb.mxu3 %v207_v27  ;;  %v167_v4 = vld [vmem:[#allocation6 + $0x290] sm:$0xff]  ;;  %v166_v8 = vld [vmem:[#allocation6 + $0x288] sm:$0xff]  ;;  %v181_v9 = vld [vmem:[#allocation6 + $0x300] sm:$0xff] }
  0x45   :  { %521 = vmatpush.msrb.mxu0 %v157_v28  ;;  %540 = vmatpush.msrb.mxu1 %v174_v29  ;;  %v199_v6 = vld [vmem:[#allocation6 + $0x390] sm:$0xff]  ;;  %v198_v10 = vld [vmem:[#allocation6 + $0x388] sm:$0xff]  ;;  %v228_v11 = vld [vmem:[#allocation6 + $0x478] sm:$0xff] }
  0x46   :  { %561 = vmatpush.msrb.mxu2 %v189_v30  ;;  %580 = vmatpush.msrb.mxu3 %v206_v31  ;;  %v260_v12 = vld [vmem:[#allocation6 + $0x578] sm:$0xff]  ;;  %v165_v13 = vld [vmem:[#allocation6 + $0x280] sm:$0xff]  ;;  %v227_v15 = vld [vmem:[#allocation6 + $0x470] sm:$0xff] }
  0x47   :  { %522 = vmatpush.msrb.mxu0 %v156_v32  ;;  %541 = vmatpush.msrb.mxu1 %v173_v33  ;;  %v197_v14 = vld [vmem:[#allocation6 + $0x380] sm:$0xff]  ;;  %v244_v16 = vld [vmem:[#allocation6 + $0x4f8] sm:$0xff]  ;;  %v259_v17 = vld [vmem:[#allocation6 + $0x570] sm:$0xff] }
  0x48   :  { %562 = vmatpush.msrb.mxu2 %v188_v34  ;;  %581 = vmatpush.msrb.mxu3 %v205_v35  ;;  %v276_v18 = vld [vmem:[#allocation6 + $0x5f8] sm:$0xff]  ;;  %v226_v19 = vld [vmem:[#allocation6 + $0x468] sm:$0xff]  ;;  %v243_v20 = vld [vmem:[#allocation6 + $0x4f0] sm:$0xff] }
  0x49   :  { %523 = vmatpush.msrb.mxu0 %v155_v36  ;;  %542 = vmatpush.msrb.mxu1 %v172_v37  ;;  %v258_v21 = vld [vmem:[#allocation6 + $0x568] sm:$0xff]  ;;  %v275_v22 = vld [vmem:[#allocation6 + $0x5f0] sm:$0xff]  ;;  %v225_v23 = vld [vmem:[#allocation6 + $0x460] sm:$0xff] }
  0x4a   :  { %563 = vmatpush.msrb.mxu2 %v187_v38  ;;  %582 = vmatpush.msrb.mxu3 %v204_v39  ;;  %v242_v24 = vld [vmem:[#allocation6 + $0x4e8] sm:$0xff]  ;;  %v257_v25 = vld [vmem:[#allocation6 + $0x560] sm:$0xff]  ;;  %v1092_v26 = vld.sshfl [vmem:[#allocation1] sm:$0xff pattern:$0x73625140] }
  0x4b   :  { %524 = vmatpush.msrb.mxu0 %v154_v41  ;;  %543 = vmatpush.msrb.mxu1 %v171_v42  ;;  %v1094_v27 = vld.sshfl [vmem:[#allocation1 + $0x10] sm:$0xff pattern:$0x73625140]  ;;  %v1096_v28 = vld.sshfl [vmem:[#allocation1 + $0x8] sm:$0xff pattern:$0x73625140] }
  0x4c   :  { %564 = vmatpush.msrb.mxu2 %v186_v44  ;;  %583 = vmatpush.msrb.mxu3 %v203_v49  ;;  %v274_v29 = vld [vmem:[#allocation6 + $0x5e8] sm:$0xff]  ;;  %v84_v30 = vld [vmem:[#allocation3 + $0x20] sm:$0x3f]  ;;  %v241_v33 = vld [vmem:[#allocation6 + $0x4e0] sm:$0xff] }
  0x4d   :  { %525 = vmatpush.msrb.mxu0 %v153_v50  ;;  %544 = vmatpush.msrb.mxu1 %v170_v51  ;;  %v1098_v31 = vld.sshfl [vmem:[#allocation1 + $0x18] sm:$0xff pattern:$0x73625140]  ;;  %v224_v32 = vld [vmem:[#allocation6 + $0x458] sm:$0xff]  ;;  %v273_v35 = vld [vmem:[#allocation6 + $0x5e0] sm:$0xff] }
  0x4e   :  { %565 = vmatpush.msrb.mxu2 %v185_v52  ;;  %584 = vmatpush.msrb.mxu3 %v202_v53  ;;  %409 = vst [vmem:[#allocation1] ss:$4 sm:$0xff] %v84_v30  ;;  %v256_v34 = vld [vmem:[#allocation6 + $0x558] sm:$0xff]  ;;  %v223_v36 = vld [vmem:[#allocation6 + $0x450] sm:$0xff]  ;;  %v222_v40 = vld [vmem:[#allocation6 + $0x448] sm:$0xff] }
  0x4f   :  { %526 = vmatpush.msrb.mxu0 %v152_v54  ;;  %545 = vmatpush.msrb.mxu1 %v169_v55  ;;  %v240_v37 = vld [vmem:[#allocation6 + $0x4d8] sm:$0xff]  ;;  %v255_v38 = vld [vmem:[#allocation6 + $0x550] sm:$0xff]  ;;  %v254_v42 = vld [vmem:[#allocation6 + $0x548] sm:$0xff] }
  0x50   :  { %566 = vmatpush.msrb.mxu2 %v184_v56  ;;  %585 = vmatpush.msrb.mxu3 %v201_v57  ;;  %v272_v39 = vld [vmem:[#allocation6 + $0x5d8] sm:$0xff]  ;;  %v239_v41 = vld [vmem:[#allocation6 + $0x4d0] sm:$0xff]  ;;  %v221_v44 = vld [vmem:[#allocation6 + $0x440] sm:$0xff] }
  0x51   :  { %527 = vmatpush.msrb.mxu0 %v151_v58  ;;  %546 = vmatpush.msrb.mxu1 %v168_v59  ;;  %v271_v43 = vld [vmem:[#allocation6 + $0x5d0] sm:$0xff]  ;;  %v237_v49 = vld [vmem:[#allocation6 + $0x4c0] sm:$0xff]  ;;  %v252_v50 = vld [vmem:[#allocation6 + $0x538] sm:$0xff] }
  0x52   :  { %567 = vmatpush.msrb.mxu2 %v183_v1  ;;  %586 = vmatpush.msrb.mxu3 %v200_v2  ;;  %v269_v51 = vld [vmem:[#allocation6 + $0x5c0] sm:$0xff]  ;;  %v219_v52 = vld [vmem:[#allocation6 + $0x430] sm:$0xff]  ;;  %v236_v53 = vld [vmem:[#allocation6 + $0x4b8] sm:$0xff] }
  0x53   :  { %528 = vmatpush.msrb.mxu0 %v150_v3  ;;  %547 = vmatpush.msrb.mxu1 %v167_v4  ;;  %v251_v54 = vld [vmem:[#allocation6 + $0x530] sm:$0xff]  ;;  %v268_v55 = vld [vmem:[#allocation6 + $0x5b8] sm:$0xff]  ;;  %v218_v56 = vld [vmem:[#allocation6 + $0x428] sm:$0xff] }
  0x54   :  { %568 = vmatpush.msrb.mxu2 %v182_v5  ;;  %587 = vmatpush.msrb.mxu3 %v199_v6  ;;  %v235_v57 = vld [vmem:[#allocation6 + $0x4b0] sm:$0xff]  ;;  %v250_v58 = vld [vmem:[#allocation6 + $0x528] sm:$0xff]  ;;  %v217_v60 = vld [vmem:[#allocation6 + $0x420] sm:$0xff] }
  0x55   :  { %490 = vmatmul.f32.vlgmr.msra.gmra.mxu2 %v393_v45  ;;  %529 = vmatpush.msrb.mxu0 %v149_v7  ;;  %v238_v45 = vld [vmem:[#allocation6 + $0x4c8] sm:$0xff]  ;;  %v267_v59 = vld [vmem:[#allocation6 + $0x5b0] sm:$0xff]  ;;  %v233_v1 = vld [vmem:[#allocation6 + $0x4a0] sm:$0xff] }
  0x56   :  { %548 = vmatpush.msrb.mxu1 %v166_v8  ;;  %569 = vmatpush.msrb.mxu2 %v181_v9  ;;  %v248_v2 = vld [vmem:[#allocation6 + $0x518] sm:$0xff]  ;;  %v265_v3 = vld [vmem:[#allocation6 + $0x5a0] sm:$0xff]  ;;  %v215_v4 = vld [vmem:[#allocation6 + $0x410] sm:$0xff] }
  0x57   :  { %588 = vmatpush.msrb.mxu3 %v198_v10  ;;  %450 = vmatmul.f32.vlgmr.msra.gmra.mxu0 %v1075_v46  ;;  %v253_v46 = vld [vmem:[#allocation6 + $0x540] sm:$0xff]  ;;  %v232_v5 = vld [vmem:[#allocation6 + $0x498] sm:$0xff]  ;;  %v247_v6 = vld [vmem:[#allocation6 + $0x510] sm:$0xff] }
  0x58   :  { %510 = vmatmul.f32.vlgmr.msra.gmra.mxu3 %v1077_v47  ;;  %594 = vmatpush.msra.mxu0 %v228_v11  ;;  %v270_v47 = vld [vmem:[#allocation6 + $0x5c8] sm:$0xff]  ;;  %v264_v7 = vld [vmem:[#allocation6 + $0x598] sm:$0xff]  ;;  %v231_v9 = vld [vmem:[#allocation6 + $0x490] sm:$0xff] }
  0x59   :  { %634 = vmatpush.msra.mxu2 %v260_v12  ;;  %549 = vmatpush.msrb.mxu1 %v165_v13  ;;  %v214_v8 = vld [vmem:[#allocation6 + $0x408] sm:$0xff]  ;;  %v263_v11 = vld [vmem:[#allocation6 + $0x590] sm:$0xff]  ;;  %v213_v12 = vld [vmem:[#allocation6 + $0x400] sm:$0xff] }
  0x5a   :  { %589 = vmatpush.msrb.mxu3 %v197_v14  ;;  %470 = vmatmul.f32.vlgmr.msra.gmra.mxu1 %v1079_v48  ;;  %v220_v48 = vld [vmem:[#allocation6 + $0x438] sm:$0xff]  ;;  %v246_v10 = vld [vmem:[#allocation6 + $0x508] sm:$0xff]  ;;  %v245_v14 = vld [vmem:[#allocation6 + $0x500] sm:$0xff] }
  0x5b   :  { %595 = vmatpush.msra.mxu0 %v227_v15  ;;  %614 = vmatpush.msra.mxu1 %v244_v16  ;;  %v230_v13 = vld [vmem:[#allocation6 + $0x488] sm:$0xff]  ;;  %v292_v16 = vld [vmem:[#allocation6 + $0x678] sm:$0xff] }
  0x5c   :  { %635 = vmatpush.msra.mxu2 %v259_v17  ;;  %654 = vmatpush.msra.mxu3 %v276_v18  ;;  %v262_v15 = vld [vmem:[#allocation6 + $0x588] sm:$0xff]  ;;  %v324_v17 = vld [vmem:[#allocation6 + $0x778] sm:$0xff]  ;;  %v229_v18 = vld [vmem:[#allocation6 + $0x480] sm:$0xff] }
  0x5d   :  { %596 = vmatpush.msra.mxu0 %v226_v19  ;;  %615 = vmatpush.msra.mxu1 %v243_v20  ;;  %v261_v19 = vld [vmem:[#allocation6 + $0x580] sm:$0xff]  ;;  %v291_v20 = vld [vmem:[#allocation6 + $0x670] sm:$0xff]  ;;  %v306_v30 = vld [vmem:[#allocation6 + $0x6e8] sm:$0xff] }
  0x5e   :  { %636 = vmatpush.msra.mxu2 %v258_v21  ;;  %655 = vmatpush.msra.mxu3 %v275_v22  ;;  %v308_v21 = vld [vmem:[#allocation6 + $0x6f8] sm:$0xff]  ;;  %v323_v22 = vld [vmem:[#allocation6 + $0x770] sm:$0xff] }
  0x5f   :  { %570 = vmatmul.f32.vlgmr.msrb.gmra.mxu2 %v1081_v61  ;;  %597 = vmatpush.msra.mxu0 %v225_v23  ;;  %v234_v61 = vld [vmem:[#allocation6 + $0x4a8] sm:$0xff]  ;;  %v340_v23 = vld [vmem:[#allocation6 + $0x7f8] sm:$0xff] }
  0x60   :  { %616 = vmatpush.msra.mxu1 %v242_v24  ;;  %637 = vmatpush.msra.mxu2 %v257_v25  ;;  %v290_v24 = vld [vmem:[#allocation6 + $0x668] sm:$0xff]  ;;  %v307_v25 = vld [vmem:[#allocation6 + $0x6f0] sm:$0xff] }
  0x61   :  { %656 = vmatpush.msra.mxu3 %v274_v29  ;;  %530 = vmatmul.f32.vlgmr.msrb.gmra.mxu0 %v1083_v62  ;;  %v249_v62 = vld [vmem:[#allocation6 + $0x520] sm:$0xff]  ;;  %v322_v29 = vld [vmem:[#allocation6 + $0x768] sm:$0xff] }
  0x62   :  { %590 = vmatmul.f32.vlgmr.msrb.gmra.mxu3 %v1085_v63  ;;  %598 = vmatpush.msra.mxu0 %v224_v32  ;;  %v266_v63 = vld [vmem:[#allocation6 + $0x5a8] sm:$0xff]  ;;  %v321_v32 = vld [vmem:[#allocation6 + $0x760] sm:$0xff] }
  0x63   :  { %617 = vmatpush.msra.mxu1 %v241_v33  ;;  %638 = vmatpush.msra.mxu2 %v256_v34  ;;  %v338_v33 = vld [vmem:[#allocation6 + $0x7e8] sm:$0xff]  ;;  %v288_v34 = vld [vmem:[#allocation6 + $0x658] sm:$0xff] }
  0x64   :  { %657 = vmatpush.msra.mxu3 %v273_v35  ;;  %550 = vmatmul.f32.vlgmr.msrb.gmra.mxu1 %v1087_v0  ;;  %v216_v0 = vld [vmem:[#allocation6 + $0x418] sm:$0xff]  ;;  %v337_v35 = vld [vmem:[#allocation6 + $0x7e0] sm:$0xff] }
  0x65   :  { %599 = vmatpush.msra.mxu0 %v223_v36  ;;  %618 = vmatpush.msra.mxu1 %v240_v37  ;;  %v287_v36 = vld [vmem:[#allocation6 + $0x650] sm:$0xff]  ;;  %v304_v37 = vld [vmem:[#allocation6 + $0x6d8] sm:$0xff] }
  0x66   :  { %639 = vmatpush.msra.mxu2 %v255_v38  ;;  %658 = vmatpush.msra.mxu3 %v272_v39  ;;  %v319_v38 = vld [vmem:[#allocation6 + $0x750] sm:$0xff]  ;;  %v336_v39 = vld [vmem:[#allocation6 + $0x7d8] sm:$0xff] }
  0x67   :  { %600 = vmatpush.msra.mxu0 %v222_v40  ;;  %619 = vmatpush.msra.mxu1 %v239_v41  ;;  %v286_v40 = vld [vmem:[#allocation6 + $0x648] sm:$0xff]  ;;  %v303_v41 = vld [vmem:[#allocation6 + $0x6d0] sm:$0xff] }
  0x68   :  { %640 = vmatpush.msra.mxu2 %v254_v42  ;;  %659 = vmatpush.msra.mxu3 %v271_v43  ;;  %v318_v42 = vld [vmem:[#allocation6 + $0x748] sm:$0xff]  ;;  %v335_v43 = vld [vmem:[#allocation6 + $0x7d0] sm:$0xff] }
  0x69   :  { %601 = vmatpush.msra.mxu0 %v221_v44  ;;  %620 = vmatpush.msra.mxu1 %v238_v45  ;;  %v285_v44 = vld [vmem:[#allocation6 + $0x640] sm:$0xff]  ;;  %v302_v45 = vld [vmem:[#allocation6 + $0x6c8] sm:$0xff] }
  0x6a   :  { %641 = vmatpush.msra.mxu2 %v253_v46  ;;  %660 = vmatpush.msra.mxu3 %v270_v47  ;;  %v317_v46 = vld [vmem:[#allocation6 + $0x740] sm:$0xff]  ;;  %v334_v47 = vld [vmem:[#allocation6 + $0x7c8] sm:$0xff] }
  0x6b   :  { %602 = vmatpush.msra.mxu0 %v220_v48  ;;  %621 = vmatpush.msra.mxu1 %v237_v49  ;;  %v284_v48 = vld [vmem:[#allocation6 + $0x638] sm:$0xff]  ;;  %v301_v49 = vld [vmem:[#allocation6 + $0x6c0] sm:$0xff] }
  0x6c   :  { %642 = vmatpush.msra.mxu2 %v252_v50  ;;  %661 = vmatpush.msra.mxu3 %v269_v51  ;;  %v316_v50 = vld [vmem:[#allocation6 + $0x738] sm:$0xff]  ;;  %v333_v51 = vld [vmem:[#allocation6 + $0x7c0] sm:$0xff] }
  0x6d   :  { %603 = vmatpush.msra.mxu0 %v219_v52  ;;  %622 = vmatpush.msra.mxu1 %v236_v53  ;;  %v283_v52 = vld [vmem:[#allocation6 + $0x630] sm:$0xff]  ;;  %v300_v53 = vld [vmem:[#allocation6 + $0x6b8] sm:$0xff] }
  0x6e   :  { %643 = vmatpush.msra.mxu2 %v251_v54  ;;  %662 = vmatpush.msra.mxu3 %v268_v55  ;;  %v315_v54 = vld [vmem:[#allocation6 + $0x730] sm:$0xff]  ;;  %v332_v55 = vld [vmem:[#allocation6 + $0x7b8] sm:$0xff] }
  0x6f   :  { %604 = vmatpush.msra.mxu0 %v218_v56  ;;  %623 = vmatpush.msra.mxu1 %v235_v57  ;;  %v282_v56 = vld [vmem:[#allocation6 + $0x628] sm:$0xff]  ;;  %v299_v57 = vld [vmem:[#allocation6 + $0x6b0] sm:$0xff] }
  0x70   :  { %644 = vmatpush.msra.mxu2 %v250_v58  ;;  %663 = vmatpush.msra.mxu3 %v267_v59  ;;  %v314_v58 = vld [vmem:[#allocation6 + $0x728] sm:$0xff]  ;;  %v331_v59 = vld [vmem:[#allocation6 + $0x7b0] sm:$0xff] }
  0x71   :  { %605 = vmatpush.msra.mxu0 %v217_v60  ;;  %624 = vmatpush.msra.mxu1 %v234_v61  ;;  %v281_v60 = vld [vmem:[#allocation6 + $0x620] sm:$0xff]  ;;  %v298_v61 = vld [vmem:[#allocation6 + $0x6a8] sm:$0xff] }
  0x72   :  { %645 = vmatpush.msra.mxu2 %v249_v62  ;;  %664 = vmatpush.msra.mxu3 %v266_v63  ;;  %v313_v62 = vld [vmem:[#allocation6 + $0x720] sm:$0xff]  ;;  %v330_v63 = vld [vmem:[#allocation6 + $0x7a8] sm:$0xff] }
  0x73   :  { %606 = vmatpush.msra.mxu0 %v216_v0  ;;  %625 = vmatpush.msra.mxu1 %v233_v1  ;;  %v280_v0 = vld [vmem:[#allocation6 + $0x618] sm:$0xff]  ;;  %v297_v1 = vld [vmem:[#allocation6 + $0x6a0] sm:$0xff] }
  0x74   :  { %646 = vmatpush.msra.mxu2 %v248_v2  ;;  %665 = vmatpush.msra.mxu3 %v265_v3  ;;  %v312_v2 = vld [vmem:[#allocation6 + $0x718] sm:$0xff]  ;;  %v329_v3 = vld [vmem:[#allocation6 + $0x7a0] sm:$0xff] }
  0x75   :  { %607 = vmatpush.msra.mxu0 %v215_v4  ;;  %626 = vmatpush.msra.mxu1 %v232_v5  ;;  %v279_v4 = vld [vmem:[#allocation6 + $0x610] sm:$0xff]  ;;  %v296_v5 = vld [vmem:[#allocation6 + $0x698] sm:$0xff] }
  0x76   :  { %647 = vmatpush.msra.mxu2 %v247_v6  ;;  %666 = vmatpush.msra.mxu3 %v264_v7  ;;  %v311_v6 = vld [vmem:[#allocation6 + $0x710] sm:$0xff]  ;;  %v328_v7 = vld [vmem:[#allocation6 + $0x798] sm:$0xff] }
  0x77   :  { %608 = vmatpush.msra.mxu0 %v214_v8  ;;  %627 = vmatpush.msra.mxu1 %v231_v9  ;;  %v278_v8 = vld [vmem:[#allocation6 + $0x608] sm:$0xff]  ;;  %v295_v9 = vld [vmem:[#allocation6 + $0x690] sm:$0xff] }
  0x78   :  { %648 = vmatpush.msra.mxu2 %v246_v10  ;;  %667 = vmatpush.msra.mxu3 %v263_v11  ;;  %v310_v10 = vld [vmem:[#allocation6 + $0x708] sm:$0xff]  ;;  %v327_v11 = vld [vmem:[#allocation6 + $0x790] sm:$0xff] }
  0x79   :  { %609 = vmatpush.msra.mxu0 %v213_v12  ;;  %628 = vmatpush.msra.mxu1 %v230_v13  ;;  %v277_v12 = vld [vmem:[#allocation6 + $0x600] sm:$0xff]  ;;  %v294_v13 = vld [vmem:[#allocation6 + $0x688] sm:$0xff] }
  0x7a   :  { %649 = vmatpush.msra.mxu2 %v245_v14  ;;  %668 = vmatpush.msra.mxu3 %v262_v15  ;;  %v309_v14 = vld [vmem:[#allocation6 + $0x700] sm:$0xff]  ;;  %v326_v15 = vld [vmem:[#allocation6 + $0x788] sm:$0xff] }
  0x7b   :  { %610 = vmatmul.f32.vlgmr.msra.gmra.mxu0 %v1092_v26  ;;  %650 = vmatmul.f32.vlgmr.msra.gmra.mxu2 %v1094_v27  ;;  %v339_v26 = vld [vmem:[#allocation6 + $0x7f0] sm:$0xff]  ;;  %v289_v27 = vld [vmem:[#allocation6 + $0x660] sm:$0xff] }
  0x7c   :  { %674 = vmatpush.msrb.mxu0 %v292_v16  ;;  %714 = vmatpush.msrb.mxu2 %v324_v17  ;;  %v405_v16 = vld.sshfl [vmem:[#allocation1 + $0x20] sm:$0xff pattern:$0x73625140]  ;;  %v407_v17 = vld.sshfl [vmem:[#allocation1 + $0x30] sm:$0xff pattern:$0x73625140] }
  0x7d   :  { %629 = vmatpush.msra.mxu1 %v229_v18  ;;  %669 = vmatpush.msra.mxu3 %v261_v19  ;;  %v356_v18 = vld [vmem:[#allocation6 + $0x878] sm:$0xff]  ;;  %v293_v19 = vld [vmem:[#allocation6 + $0x680] sm:$0xff] }
  0x7e   :  { %630 = vmatmul.f32.vlgmr.msra.gmra.mxu1 %v1096_v28  ;;  %670 = vmatmul.f32.vlgmr.msra.gmra.mxu3 %v1098_v31  ;;  %v305_v28 = vld [vmem:[#allocation6 + $0x6e0] sm:$0xff]  ;;  %v320_v31 = vld [vmem:[#allocation6 + $0x758] sm:$0xff] }
  0x7f   :  { %675 = vmatpush.msrb.mxu0 %v291_v20  ;;  %694 = vmatpush.msrb.mxu1 %v308_v21  ;;  %v325_v20 = vld [vmem:[#allocation6 + $0x780] sm:$0xff] }
  0x80   :  { %715 = vmatpush.msrb.mxu2 %v323_v22  ;;  %734 = vmatpush.msrb.mxu3 %v340_v23  ;;  %v406_v21 = vld.sshfl [vmem:[#allocation1 + $0x28] sm:$0xff pattern:$0x73625140]  ;;  %v408_v22 = vld.sshfl [vmem:[#allocation1 + $0x38] sm:$0xff pattern:$0x73625140] }
  0x81   :  { %676 = vmatpush.msrb.mxu0 %v290_v24  ;;  %695 = vmatpush.msrb.mxu1 %v307_v25  ;;  %v355_v23 = vld [vmem:[#allocation6 + $0x870] sm:$0xff]  ;;  %v372_v24 = vld [vmem:[#allocation6 + $0x8f8] sm:$0xff]  ;;  %v378_v25 = vld [vmem:[#allocation6 + $0x928] sm:$0xff] }
  0x82   :  { %716 = vmatpush.msrb.mxu2 %v322_v29  ;;  %735 = vmatpush.msrb.mxu3 %v339_v26  ;;  %v354_v29 = vld [vmem:[#allocation6 + $0x868] sm:$0xff]  ;;  %v371_v26 = vld [vmem:[#allocation6 + $0x8f0] sm:$0xff] }
  0x83   :  { %677 = vmatpush.msrb.mxu0 %v289_v27  ;;  %696 = vmatpush.msrb.mxu1 %v306_v30  ;;  %v377_v27 = vld [vmem:[#allocation6 + $0x920] sm:$0xff] }
  0x84   :  { %717 = vmatpush.msrb.mxu2 %v321_v32  ;;  %736 = vmatpush.msrb.mxu3 %v338_v33  ;;  %v353_v30 = vld [vmem:[#allocation6 + $0x860] sm:$0xff]  ;;  %v370_v32 = vld [vmem:[#allocation6 + $0x8e8] sm:$0xff]  ;;  %v376_v33 = vld [vmem:[#allocation6 + $0x918] sm:$0xff] }
  0x85   :  { %678 = vmatpush.msrb.mxu0 %v288_v34  ;;  %697 = vmatpush.msrb.mxu1 %v305_v28  ;;  %v352_v34 = vld [vmem:[#allocation6 + $0x858] sm:$0xff]  ;;  %v369_v28 = vld [vmem:[#allocation6 + $0x8e0] sm:$0xff] }
  0x86   :  { %718 = vmatpush.msrb.mxu2 %v320_v31  ;;  %737 = vmatpush.msrb.mxu3 %v337_v35  ;;  %v375_v31 = vld [vmem:[#allocation6 + $0x910] sm:$0xff] }
  0x87   :  { %679 = vmatpush.msrb.mxu0 %v287_v36  ;;  %698 = vmatpush.msrb.mxu1 %v304_v37  ;;  %v351_v35 = vld [vmem:[#allocation6 + $0x850] sm:$0xff]  ;;  %v368_v36 = vld [vmem:[#allocation6 + $0x8d8] sm:$0xff]  ;;  %v374_v37 = vld [vmem:[#allocation6 + $0x908] sm:$0xff] }
  0x88   :  { %719 = vmatpush.msrb.mxu2 %v319_v38  ;;  %738 = vmatpush.msrb.mxu3 %v336_v39  ;;  %v350_v38 = vld [vmem:[#allocation6 + $0x848] sm:$0xff]  ;;  %v367_v39 = vld [vmem:[#allocation6 + $0x8d0] sm:$0xff] }
  0x89   :  { %680 = vmatpush.msrb.mxu0 %v286_v40  ;;  %699 = vmatpush.msrb.mxu1 %v303_v41  ;;  %v373_v40 = vld [vmem:[#allocation6 + $0x900] sm:$0xff] }
  0x8a   :  { %720 = vmatpush.msrb.mxu2 %v318_v42  ;;  %739 = vmatpush.msrb.mxu3 %v335_v43  ;;  %v349_v41 = vld [vmem:[#allocation6 + $0x840] sm:$0xff]  ;;  %v366_v43 = vld [vmem:[#allocation6 + $0x8c8] sm:$0xff] }
  0x8b   :  { %681 = vmatpush.msrb.mxu0 %v285_v44  ;;  %700 = vmatpush.msrb.mxu1 %v302_v45  ;;  %v412_v42 = vld.sshfl [vmem:[#allocation1 + $0x10] sm:$0xff pattern:$0x73625140]  ;;  %v348_v44 = vld [vmem:[#allocation6 + $0x838] sm:$0xff] }
  0x8c   :  { %721 = vmatpush.msrb.mxu2 %v317_v46  ;;  %740 = vmatpush.msrb.mxu3 %v334_v47  ;;  %v365_v45 = vld [vmem:[#allocation6 + $0x8c0] sm:$0xff]  ;;  %v347_v46 = vld [vmem:[#allocation6 + $0x830] sm:$0xff]  ;;  %v364_v47 = vld [vmem:[#allocation6 + $0x8b8] sm:$0xff] }
  0x8d   :  { %682 = vmatpush.msrb.mxu0 %v284_v48  ;;  %701 = vmatpush.msrb.mxu1 %v301_v49  ;;  %v346_v48 = vld [vmem:[#allocation6 + $0x828] sm:$0xff]  ;;  %v363_v49 = vld [vmem:[#allocation6 + $0x8b0] sm:$0xff] }
  0x8e   :  { %722 = vmatpush.msrb.mxu2 %v316_v50  ;;  %741 = vmatpush.msrb.mxu3 %v333_v51  ;;  %v345_v50 = vld [vmem:[#allocation6 + $0x820] sm:$0xff]  ;;  %v362_v51 = vld [vmem:[#allocation6 + $0x8a8] sm:$0xff] }
  0x8f   :  { %683 = vmatpush.msrb.mxu0 %v283_v52  ;;  %702 = vmatpush.msrb.mxu1 %v300_v53  ;;  %v344_v52 = vld [vmem:[#allocation6 + $0x818] sm:$0xff]  ;;  %v361_v53 = vld [vmem:[#allocation6 + $0x8a0] sm:$0xff] }
  0x90   :  { %723 = vmatpush.msrb.mxu2 %v315_v54  ;;  %742 = vmatpush.msrb.mxu3 %v332_v55  ;;  %v343_v54 = vld [vmem:[#allocation6 + $0x810] sm:$0xff]  ;;  %v360_v55 = vld [vmem:[#allocation6 + $0x898] sm:$0xff] }
  0x91   :  { %684 = vmatpush.msrb.mxu0 %v282_v56  ;;  %703 = vmatpush.msrb.mxu1 %v299_v57  ;;  %v342_v56 = vld [vmem:[#allocation6 + $0x808] sm:$0xff]  ;;  %v359_v57 = vld [vmem:[#allocation6 + $0x890] sm:$0xff] }
  0x92   :  { %724 = vmatpush.msrb.mxu2 %v314_v58  ;;  %743 = vmatpush.msrb.mxu3 %v331_v59  ;;  %v341_v58 = vld [vmem:[#allocation6 + $0x800] sm:$0xff]  ;;  %v358_v59 = vld [vmem:[#allocation6 + $0x888] sm:$0xff] }
  0x93   :  { %685 = vmatpush.msrb.mxu0 %v281_v60  ;;  %704 = vmatpush.msrb.mxu1 %v298_v61  ;;  %v410_v60 = vld.sshfl [vmem:[#allocation1] sm:$0xff pattern:$0x73625140]  ;;  %v357_v61 = vld [vmem:[#allocation6 + $0x880] sm:$0xff] }
  0x94   :  { %725 = vmatpush.msrb.mxu2 %v313_v62  ;;  %744 = vmatpush.msrb.mxu3 %v330_v63  ;;  %v411_v62 = vld.sshfl [vmem:[#allocation1 + $0x8] sm:$0xff pattern:$0x73625140]  ;;  %v1028_v63 = vmov 0  }
  0x95   :  { %686 = vmatpush.msrb.mxu0 %v280_v0  ;;  %705 = vmatpush.msrb.mxu1 %v297_v1  ;;  %v824_v0 = vld [vmem:[#allocation2] sm:$0x1]  ;;  %v888_v1 = vld [vmem:[#allocation8] ss:$0 sm:$0xff] }
  0x96   :  { %726 = vmatpush.msrb.mxu2 %v312_v2  ;;  %745 = vmatpush.msrb.mxu3 %v329_v3 }
  0x97   :  { %687 = vmatpush.msrb.mxu0 %v279_v4  ;;  %706 = vmatpush.msrb.mxu1 %v296_v5 }
  0x98   :  { %727 = vmatpush.msrb.mxu2 %v311_v6  ;;  %746 = vmatpush.msrb.mxu3 %v328_v7 }
  0x99   :  { %688 = vmatpush.msrb.mxu0 %v278_v8  ;;  %707 = vmatpush.msrb.mxu1 %v295_v9 }
  0x9a   :  { %728 = vmatpush.msrb.mxu2 %v310_v10  ;;  %747 = vmatpush.msrb.mxu3 %v327_v11 }
  0x9b   :  { %689 = vmatpush.msrb.mxu0 %v277_v12  ;;  %708 = vmatpush.msrb.mxu1 %v294_v13 }
  0x9c   :  { %729 = vmatpush.msrb.mxu2 %v309_v14  ;;  %748 = vmatpush.msrb.mxu3 %v326_v15 }
  0x9d   :  { %690 = vmatmul.f32.vlgmr.msrb.gmra.mxu0 %v405_v16  ;;  %730 = vmatmul.f32.vlgmr.msrb.gmra.mxu2 %v407_v17 }
  0x9e   :  { %754 = vmatpush.msra.mxu0 %v356_v18  ;;  %709 = vmatpush.msrb.mxu1 %v293_v19 }
  0x9f   :  { %749 = vmatpush.msrb.mxu3 %v325_v20  ;;  %710 = vmatmul.f32.vlgmr.msrb.gmra.mxu1 %v406_v21 }
  0xa0   :  { %750 = vmatmul.f32.vlgmr.msrb.gmra.mxu3 %v408_v22  ;;  %755 = vmatpush.msra.mxu0 %v355_v23 }
  0xa1   :  { %774 = vmatpush.msra.mxu1 %v372_v24  ;;  %804 = vmatpush.msra.mxu2 %v378_v25 }
  0xa2   :  { %756 = vmatpush.msra.mxu0 %v354_v29  ;;  %887 = vset.pattern.permute.xlu0 %v1028_v63 }
  0xa3   :  { %775 = vmatpush.msra.mxu1 %v371_v26  ;;  %805 = vmatpush.msra.mxu2 %v377_v27 }
  0xa4   :  { %757 = vmatpush.msra.mxu0 %v353_v30  ;;  %827 = vperm.xlu0 %887, %v824_v0  }
  0xa5   :  { %776 = vmatpush.msra.mxu1 %v370_v32  ;;  %806 = vmatpush.msra.mxu2 %v376_v33 }
  0xa6   :  { %758 = vmatpush.msra.mxu0 %v352_v34 }
  0xa7   :  { %777 = vmatpush.msra.mxu1 %v369_v28  ;;  %807 = vmatpush.msra.mxu2 %v375_v31 }
  0xa8   :  { %759 = vmatpush.msra.mxu0 %v351_v35 }
  0xa9   :  { %778 = vmatpush.msra.mxu1 %v368_v36  ;;  %808 = vmatpush.msra.mxu2 %v374_v37 }
  0xaa   :  { %760 = vmatpush.msra.mxu0 %v350_v38 }
  0xab   :  { %779 = vmatpush.msra.mxu1 %v367_v39  ;;  %809 = vmatpush.msra.mxu2 %v373_v40  ;;  %v889_v40 = vld [vmem:[#allocation9] ss:$0 sm:$0xff] }
  0xac   :  { %761 = vmatpush.msra.mxu0 %v349_v41  ;;  %877 = vmatmul.msk.f32.vlgmr.msra.gmra.mxu2 %vm431_vm0, %v412_v42 }
  0xad   :  { %780 = vmatpush.msra.mxu1 %v366_v43 }
  0xae   :  { %762 = vmatpush.msra.mxu0 %v348_v44 }
  0xaf   :  { %781 = vmatpush.msra.mxu1 %v365_v45 }
  0xb0   :  { %763 = vmatpush.msra.mxu0 %v347_v46 }
  0xb1   :  { %782 = vmatpush.msra.mxu1 %v364_v47 }
  0xb2   :  { %764 = vmatpush.msra.mxu0 %v346_v48 }
  0xb3   :  { %783 = vmatpush.msra.mxu1 %v363_v49 }
  0xb4   :  { %765 = vmatpush.msra.mxu0 %v345_v50 }
  0xb5   :  { %784 = vmatpush.msra.mxu1 %v362_v51 }
  0xb6   :  { %766 = vmatpush.msra.mxu0 %v344_v52 }
  0xb7   :  { %785 = vmatpush.msra.mxu1 %v361_v53 }
  0xb8   :  { %767 = vmatpush.msra.mxu0 %v343_v54  ;;  %v852_v54 = vlaneseq }
  0xb9   :  { %786 = vmatpush.msra.mxu1 %v360_v55 }
  0xba   :  { %768 = vmatpush.msra.mxu0 %v342_v56 }
  0xbb   :  { %787 = vmatpush.msra.mxu1 %v359_v57 }
  0xbc   :  { %769 = vmatpush.msra.mxu0 %v341_v58 }
  0xbd   :  { %788 = vmatpush.msra.mxu1 %v358_v59  ;;  %770 = vmatmul.f32.vlgmr.msra.gmra.mxu0 %v410_v60  ;;  %v853_v59 = vand.u32 127, %v852_v54 }
  0xbf   :  { %789 = vmatpush.msra.mxu1 %v357_v61 }
  0xc0   :  { %790 = vmatmul.f32.vlgmr.msra.gmra.mxu1 %v411_v62 }
  0xd4   :  { %v451_v2 = vpop.f32.mrf.mxu0 }
  0xd5   :  { %v452_v3 = vadd.f32 %v888_v1, %v451_v2 }
  0xd7   :  { %v471_v4 = vpop.f32.mrf.mxu1 }
  0xd8   :  { %v472_v5 = vadd.f32 %v471_v4, %v452_v3  ;;  %v491_v6 = vpop.f32.mrf.mxu2 }
  0xda   :  { %v492_v7 = vadd.f32 %v491_v6, %v472_v5 }
  0xdb   :  { %v511_v8 = vpop.f32.mrf.mxu3 }
  0xdc   :  { %v512_v9 = vadd.f32 %v511_v8, %v492_v7 }
  0xde   :  { %v531_v10 = vpop.f32.mrf.mxu0 }
  0xdf   :  { %v532_v11 = vadd.f32 %v531_v10, %v512_v9 }
  0xe1   :  { %v551_v12 = vpop.f32.mrf.mxu1 }
  0xe2   :  { %v552_v13 = vadd.f32 %v551_v12, %v532_v11  ;;  %v571_v14 = vpop.f32.mrf.mxu2 }
  0xe4   :  { %v572_v15 = vadd.f32 %v571_v14, %v552_v13 }
  0xe5   :  { %v591_v16 = vpop.f32.mrf.mxu3 }
  0xe6   :  { %v592_v18 = vadd.f32 %v591_v16, %v572_v15 }
  0xf8   :  { %v611_v17 = vpop.f32.mrf.mxu0 }
  0xf9   :  { %v612_v19 = vadd.f32 %v611_v17, %v592_v18 }
  0xfb   :  { %v631_v20 = vpop.f32.mrf.mxu1 }
  0xfc   :  { %v632_v22 = vadd.f32 %v631_v20, %v612_v19 }
  0xfe   :  { %v651_v21 = vpop.f32.mrf.mxu2 }
  0xff   :  { %v652_v23 = vadd.f32 %v651_v21, %v632_v22 }
 0x101   :  { %v671_v24 = vpop.f32.mrf.mxu3 }
 0x102   :  { %v672_v29 = vadd.f32 %v671_v24, %v652_v23 }
 0x116   :  { %v828_v44 = vpop.permute.xlu0 %827 }
 0x117   :  { %v830_v45 = vperm.slane %v828_v44, 0 }
 0x11a   :  { %v691_v25 = vpop.f32.mrf.mxu0 }
 0x11b   :  { %v692_v26 = vadd.f32 %v691_v25, %v672_v29 }
 0x11c   :  { %v711_v27 = vpop.f32.mrf.mxu1 }
 0x11d   :  { %v712_v32 = vadd.f32 %v711_v27, %v692_v26 }
 0x120   :  { %v731_v30 = vpop.f32.mrf.mxu2 }
 0x121   :  { %v732_v33 = vadd.f32 %v731_v30, %v712_v32 }
 0x123   :  { %v751_v34 = vpop.f32.mrf.mxu3 }
 0x124   :  { %v752_v28 = vadd.f32 %v751_v34, %v732_v33 }
 0x12f   :  { %v811_v37 = vpop.f32.mrf.mxu2 }
 0x13a   :  { %v771_v31 = vpop.f32.mrf.mxu0 }
 0x13b   :  { %v772_v35 = vadd.f32 %v771_v31, %v752_v28 }
 0x13d   :  { %v791_v36 = vpop.f32.mrf.mxu1 }
 0x13e   :  { %v792_v38 = vadd.f32 %v791_v36, %v772_v35 }
 0x140   :  { %v812_v39 = vadd.f32 %v811_v37, %v792_v38 }
 0x142   :  { %v814_v41 = vmax.f32 %v812_v39, 0.0 }
 0x144   :  { %v819_v42 = vmul.f32 %v889_v40, %v814_v41 }
 0x146   :  { %v821_v43 = vsel %vm820_vm1, %v819_v42, 0.0 }
 0x147   :  { %822 = vadd.xlane.f32.xlu0 %v821_v43 }
 0x1ba   :  { %v823_v46 = vpop.xlane.xlu0 %822 }
 0x1bb   :  { %v831_v47 = vadd.f32 %v830_v45, %v823_v46 }
 0x1bd   :  { %v878_v48 = vmul.f32 -1.442695, %v831_v47 }
 0x1bf   :  { %890 = vpow2.f32 %v878_v48 }
 0x1c5   :  { %v891_v49 = vpop.eup %890 }
 0x1c6   :  { %v835_v50 = vadd.f32 1.0, %v891_v49 }
 0x1c8   :  { %892 = vrcp.f32 %v835_v50  ;;  %v847_v55 = vand.u32 2147483648, %v835_v50  ;;  %v845_v57 = vand.u32 2147483647, %v835_v50  ;;  %vm841_vm3 = vweird.f32 %v835_v50 }
 0x1ca   :  { %v848_v60 = vor.u32 1.1754944e-38, %v847_v55  ;;  %vm846_vm5 = vcmp.eq.f32.partialorder %v845_v57, 8.507059e+37 }
 0x1ce   :  { %v893_v51 = vpop.eup %892 }
 0x1cf   :  { %v837_v52 = vmul.f32 %v893_v51, %v835_v50  ;;  %vm842_vm2 = vweird.f32 %v893_v51 }
 0x1d0   :  { %vm843_vm4 = vmor %vm841_vm3, %vm842_vm2 }
 0x1d1   :  { %v838_v53 = vsub.f32 1.0, %v837_v52 }
 0x1d3   :  { %v839_v56 = vmul.f32 %v893_v51, %v838_v53 }
 0x1d5   :  { %v840_v58 = vadd.f32 %v893_v51, %v839_v56 }
 0x1d7   :  { %v844_v61 = vsel %vm843_vm4, %v893_v51, %v840_v58 }
 0x1d8   :  { %v849_v62 = vsel %vm846_vm5, %v848_v60, %v844_v61 }
 0x1d9   :  { %v854_v63 = vperm.slane %v849_v62, %v853_v59 }
 0x1db   :  { %857 = vst.msk [vmem:[#allocation11] sm:$0x1] %vm856_vm6, %v854_v63 }
 0x1dc   :  { %868 = dma.vmem_to_hbm [thread:$0]  %s864_s3, 16, %s866_s16, [#allocation5]  }
 0x1dd   :  { %1020 = dma.done.wait [#allocation5], 16  }
 0x1de   :  { %1021 = vsyncadd [#allocation5], 4294967280 }
 0x1df   :  { %873 = vsyncpa [#allocation4], 1 }
 0x1e0   :  { %874 = vsyncpa [#allocation7], 1 }
 0x1e1   :  { %875 = vsyncpa [#allocation10], 1 }
 0x1e2   :  { %876 = vsyncpa [#allocation5], 1 }

// kernel: tpu_custom_call.1
= control target key start
LH: loop header
LB: loop body
LE: loop exit
PB: predicated region body
PF: predicated region fallthrough
CT: control target
= control target key end

     0   :  { %s1060_s0 = inlined_call_operand.hbm [shape: f32[2,2352], index: 0, kind: input, shape index: {}]   ;;  %s1061_s1 = inlined_call_operand.hbm [shape: f32[2352,128], index: 1, kind: input, shape index: {}]   ;;  %s1062_s2 = inlined_call_operand.hbm [shape: f32[1,128], index: 2, kind: input, shape index: {}]   ;;  %s1063_s3 = inlined_call_operand.hbm [shape: f32[1,128], index: 3, kind: input, shape index: {}]   ;;  %s1064_s4 = inlined_call_operand.<no memory space> [shape: f32[1,1], index: 4, kind: input, shape index: {}]   ;;  %s1065_s5 = inlined_call_operand.vmem [shape: f32[2,1], index: 5, kind: output, shape index: {}]  }
   0x1   :  { %v10_v0 = vstv %s1064_s4 }
   0x2   :  { %11 = vst [vmem:[#allocation2] sm:$0x1] %v10_v0 }
   0x3   :  { %12 = vsyncpa [#allocation4], 0 }
   0x4   :  { %13 = vsyncpa [#allocation6], 0  ;;  %s30_s22 = sshll.u32 %s1061_s1, 4  ;;  %s31_s22 = int_to_ptr.hbm [resolvable:$true] %s30_s22 }
   0x5   :  { %14 = vsyncpa [#allocation9], 0  ;;  %s973_s23 = smov [#allocation5]   ;;  %s20_s27 = sshll.u32 %s1060_s0, 4  ;;  %s21_s27 = int_to_ptr.hbm [resolvable:$true] %s20_s27 }
   0x6   :  { %s32_s24 = sshll.u32 %s973_s23, 4  ;;  %s974_s28 = smov 128   ;;  %s33_s24 = int_to_ptr.vmem [resolvable:$true] %s32_s24 }
   0x7   :  { %s975_s29 = smov 8   ;;  %s976_s4 = smov [#allocation3]  }
   0x8   :  { %38 = dma.hbm_to_vmem [thread:$0]  %s31_s22, 37632, %s33_s24, [#allocation6], %s974_s28, %s974_s28, %s975_s29  }
   0x9   :  { %s22_s30 = sshll.u32 %s976_s4, 4  ;;  %s44_s8 = sshll.u32 %s1062_s2, 4  ;;  %s23_s30 = int_to_ptr.vmem [resolvable:$true] %s22_s30  ;;  %s45_s8 = int_to_ptr.hbm [resolvable:$true] %s44_s8 }
   0xa   :  { %25 = dma.hbm_to_vmem [thread:$0]  %s21_s27, 608, %s23_s30, [#allocation4]  }
   0xb   :  { %s55_s10 = sshll.u32 %s1063_s3, 4  ;;  %s977_s11 = smov [#allocation7]   ;;  %s56_s10 = int_to_ptr.hbm [resolvable:$true] %s55_s10 }
   0xc   :  { %s46_s12 = sshll.u32 %s977_s11, 4  ;;  %s978_s0 = smov [#allocation8]   ;;  %s47_s12 = int_to_ptr.vmem [resolvable:$true] %s46_s12 }
   0xd   :  { %49 = dma.hbm_to_vmem [thread:$0]  %s45_s8, 16, %s47_s12, [#allocation6]  }
   0xe   :  { %s57_s13 = sshll.u32 %s978_s0, 4  ;;  %s58_s13 = int_to_ptr.vmem [resolvable:$true] %s57_s13 }
   0xf   :  { %60 = dma.hbm_to_vmem [thread:$0]  %s56_s10, 16, %s58_s13, [#allocation9]  }
  0x10   :  { %967 = dma.done.wait [#allocation4], 608  }
  0x11   :  { %968 = vsyncadd [#allocation4], 4294966688 }
  0x12   :  { %969 = dma.done.wait [#allocation6], 37648  }
  0x13   :  { %970 = vsyncadd [#allocation6], 4294929648 }
  0x14   :  { %971 = dma.done.wait [#allocation9], 16  }
  0x15   :  { %972 = vsyncadd [#allocation9], 4294967280  ;;  %v99_v1 = vld [vmem:[#allocation5 + $0x78] sm:$0xff]  ;;  %v98_v3 = vld [vmem:[#allocation5 + $0x70] sm:$0xff]  ;;  %vm430_vm0 = vcmask 392192   ;;  %vm819_vm1 = vcmask 1041408  }
  0x16   :  { %v131_v2 = vld [vmem:[#allocation5 + $0x178] sm:$0xff]  ;;  %433 = vmatpush.msra.mxu0 %v99_v1  ;;  %v130_v5 = vld [vmem:[#allocation5 + $0x170] sm:$0xff]  ;;  %v97_v7 = vld [vmem:[#allocation5 + $0x68] sm:$0xff]  ;;  %vm847_vm5 = vcmask 1024  }
  0x17   :  { %473 = vmatpush.msra.mxu2 %v131_v2  ;;  %v115_v4 = vld [vmem:[#allocation5 + $0xf8] sm:$0xff]  ;;  %v114_v8 = vld [vmem:[#allocation5 + $0xf0] sm:$0xff]  ;;  %v129_v9 = vld [vmem:[#allocation5 + $0x168] sm:$0xff] }
  0x18   :  { %v147_v6 = vld [vmem:[#allocation5 + $0x1f8] sm:$0xff]  ;;  %453 = vmatpush.msra.mxu1 %v115_v4  ;;  %434 = vmatpush.msra.mxu0 %v98_v3  ;;  %v146_v10 = vld [vmem:[#allocation5 + $0x1f0] sm:$0xff]  ;;  %v113_v11 = vld [vmem:[#allocation5 + $0xe8] sm:$0xff] }
  0x19   :  { %493 = vmatpush.msra.mxu3 %v147_v6  ;;  %474 = vmatpush.msra.mxu2 %v130_v5  ;;  %v96_v12 = vld [vmem:[#allocation5 + $0x60] sm:$0xff]  ;;  %v145_v14 = vld [vmem:[#allocation5 + $0x1e8] sm:$0xff]  ;;  %v95_v17 = vld [vmem:[#allocation5 + $0x58] sm:$0xff] }
  0x1a   :  { %454 = vmatpush.msra.mxu1 %v114_v8  ;;  %v128_v13 = vld [vmem:[#allocation5 + $0x160] sm:$0xff]  ;;  %435 = vmatpush.msra.mxu0 %v97_v7  ;;  %v127_v18 = vld [vmem:[#allocation5 + $0x158] sm:$0xff]  ;;  %v94_v21 = vld [vmem:[#allocation5 + $0x50] sm:$0xff] }
  0x1b   :  { %494 = vmatpush.msra.mxu3 %v146_v10  ;;  %475 = vmatpush.msra.mxu2 %v129_v9  ;;  %v112_v15 = vld [vmem:[#allocation5 + $0xe0] sm:$0xff]  ;;  %v111_v19 = vld [vmem:[#allocation5 + $0xd8] sm:$0xff]  ;;  %v126_v22 = vld [vmem:[#allocation5 + $0x150] sm:$0xff] }
  0x1c   :  { %v144_v16 = vld [vmem:[#allocation5 + $0x1e0] sm:$0xff]  ;;  %455 = vmatpush.msra.mxu1 %v113_v11  ;;  %436 = vmatpush.msra.mxu0 %v96_v12  ;;  %v143_v20 = vld [vmem:[#allocation5 + $0x1d8] sm:$0xff]  ;;  %v110_v23 = vld [vmem:[#allocation5 + $0xd0] sm:$0xff] }
  0x1d   :  { %495 = vmatpush.msra.mxu3 %v145_v14  ;;  %476 = vmatpush.msra.mxu2 %v128_v13  ;;  %v142_v24 = vld [vmem:[#allocation5 + $0x1d0] sm:$0xff]  ;;  %v93_v25 = vld [vmem:[#allocation5 + $0x48] sm:$0xff]  ;;  %v92_v29 = vld [vmem:[#allocation5 + $0x40] sm:$0xff] }
  0x1e   :  { %456 = vmatpush.msra.mxu1 %v112_v15  ;;  %437 = vmatpush.msra.mxu0 %v95_v17  ;;  %v125_v26 = vld [vmem:[#allocation5 + $0x148] sm:$0xff]  ;;  %v124_v30 = vld [vmem:[#allocation5 + $0x140] sm:$0xff]  ;;  %v91_v33 = vld [vmem:[#allocation5 + $0x38] sm:$0xff] }
  0x1f   :  { %496 = vmatpush.msra.mxu3 %v144_v16  ;;  %477 = vmatpush.msra.mxu2 %v127_v18  ;;  %v109_v27 = vld [vmem:[#allocation5 + $0xc8] sm:$0xff]  ;;  %v108_v31 = vld [vmem:[#allocation5 + $0xc0] sm:$0xff]  ;;  %v123_v34 = vld [vmem:[#allocation5 + $0x138] sm:$0xff] }
  0x20   :  { %457 = vmatpush.msra.mxu1 %v111_v19  ;;  %438 = vmatpush.msra.mxu0 %v94_v21  ;;  %v141_v28 = vld [vmem:[#allocation5 + $0x1c8] sm:$0xff]  ;;  %v140_v32 = vld [vmem:[#allocation5 + $0x1c0] sm:$0xff]  ;;  %v107_v35 = vld [vmem:[#allocation5 + $0xb8] sm:$0xff] }
  0x21   :  { %497 = vmatpush.msra.mxu3 %v143_v20  ;;  %478 = vmatpush.msra.mxu2 %v126_v22  ;;  %v139_v36 = vld [vmem:[#allocation5 + $0x1b8] sm:$0xff]  ;;  %v90_v37 = vld [vmem:[#allocation5 + $0x30] sm:$0xff]  ;;  %v89_v41 = vld [vmem:[#allocation5 + $0x28] sm:$0xff] }
  0x22   :  { %458 = vmatpush.msra.mxu1 %v110_v23  ;;  %439 = vmatpush.msra.mxu0 %v93_v25  ;;  %v122_v38 = vld [vmem:[#allocation5 + $0x130] sm:$0xff]  ;;  %v121_v42 = vld [vmem:[#allocation5 + $0x128] sm:$0xff]  ;;  %v88_v45 = vld [vmem:[#allocation5 + $0x20] sm:$0xff] }
  0x23   :  { %498 = vmatpush.msra.mxu3 %v142_v24  ;;  %479 = vmatpush.msra.mxu2 %v125_v26  ;;  %v106_v39 = vld [vmem:[#allocation5 + $0xb0] sm:$0xff]  ;;  %v105_v43 = vld [vmem:[#allocation5 + $0xa8] sm:$0xff]  ;;  %v120_v46 = vld [vmem:[#allocation5 + $0x120] sm:$0xff] }
  0x24   :  { %459 = vmatpush.msra.mxu1 %v109_v27  ;;  %440 = vmatpush.msra.mxu0 %v92_v29  ;;  %v138_v40 = vld [vmem:[#allocation5 + $0x1b0] sm:$0xff]  ;;  %v137_v44 = vld [vmem:[#allocation5 + $0x1a8] sm:$0xff]  ;;  %v104_v47 = vld [vmem:[#allocation5 + $0xa0] sm:$0xff] }
  0x25   :  { %499 = vmatpush.msra.mxu3 %v141_v28  ;;  %480 = vmatpush.msra.mxu2 %v124_v30  ;;  %v136_v48 = vld [vmem:[#allocation5 + $0x1a0] sm:$0xff]  ;;  %v87_v49 = vld [vmem:[#allocation5 + $0x18] sm:$0xff]  ;;  %v86_v53 = vld [vmem:[#allocation5 + $0x10] sm:$0xff] }
  0x26   :  { %460 = vmatpush.msra.mxu1 %v108_v31  ;;  %441 = vmatpush.msra.mxu0 %v91_v33  ;;  %v119_v50 = vld [vmem:[#allocation5 + $0x118] sm:$0xff]  ;;  %v118_v54 = vld [vmem:[#allocation5 + $0x110] sm:$0xff]  ;;  %v85_v57 = vld [vmem:[#allocation5 + $0x8] sm:$0xff] }
  0x27   :  { %500 = vmatpush.msra.mxu3 %v140_v32  ;;  %481 = vmatpush.msra.mxu2 %v123_v34  ;;  %v103_v51 = vld [vmem:[#allocation5 + $0x98] sm:$0xff]  ;;  %v102_v55 = vld [vmem:[#allocation5 + $0x90] sm:$0xff]  ;;  %v117_v58 = vld [vmem:[#allocation5 + $0x108] sm:$0xff] }
  0x28   :  { %461 = vmatpush.msra.mxu1 %v107_v35  ;;  %442 = vmatpush.msra.mxu0 %v90_v37  ;;  %v135_v52 = vld [vmem:[#allocation5 + $0x198] sm:$0xff]  ;;  %v134_v56 = vld [vmem:[#allocation5 + $0x190] sm:$0xff]  ;;  %v101_v59 = vld [vmem:[#allocation5 + $0x88] sm:$0xff] }
  0x29   :  { %501 = vmatpush.msra.mxu3 %v139_v36  ;;  %482 = vmatpush.msra.mxu2 %v122_v38  ;;  %v133_v60 = vld [vmem:[#allocation5 + $0x188] sm:$0xff]  ;;  %v84_v61 = vld [vmem:[#allocation5] sm:$0xff]  ;;  %v163_v63 = vld [vmem:[#allocation5 + $0x278] sm:$0xff] }
  0x2a   :  { %462 = vmatpush.msra.mxu1 %v106_v39  ;;  %443 = vmatpush.msra.mxu0 %v89_v41  ;;  %v116_v62 = vld [vmem:[#allocation5 + $0x100] sm:$0xff]  ;;  %v195_v0 = vld [vmem:[#allocation5 + $0x378] sm:$0xff]  ;;  %v162_v3 = vld [vmem:[#allocation5 + $0x270] sm:$0xff] }
  0x2b   :  { %502 = vmatpush.msra.mxu3 %v138_v40  ;;  %483 = vmatpush.msra.mxu2 %v121_v42  ;;  %v100_v1 = vld [vmem:[#allocation5 + $0x80] sm:$0xff]  ;;  %v179_v4 = vld [vmem:[#allocation5 + $0x2f8] sm:$0xff]  ;;  %v194_v5 = vld [vmem:[#allocation5 + $0x370] sm:$0xff] }
  0x2c   :  { %463 = vmatpush.msra.mxu1 %v105_v43  ;;  %444 = vmatpush.msra.mxu0 %v88_v45  ;;  %v132_v2 = vld [vmem:[#allocation5 + $0x180] sm:$0xff]  ;;  %v211_v6 = vld [vmem:[#allocation5 + $0x3f8] sm:$0xff]  ;;  %v161_v7 = vld [vmem:[#allocation5 + $0x268] sm:$0xff] }
  0x2d   :  { %503 = vmatpush.msra.mxu3 %v137_v44  ;;  %484 = vmatpush.msra.mxu2 %v120_v46  ;;  %v178_v8 = vld [vmem:[#allocation5 + $0x2f0] sm:$0xff]  ;;  %v193_v9 = vld [vmem:[#allocation5 + $0x368] sm:$0xff]  ;;  %v160_v11 = vld [vmem:[#allocation5 + $0x260] sm:$0xff] }
  0x2e   :  { %464 = vmatpush.msra.mxu1 %v104_v47  ;;  %445 = vmatpush.msra.mxu0 %v87_v49  ;;  %v210_v10 = vld [vmem:[#allocation5 + $0x3f0] sm:$0xff]  ;;  %v177_v12 = vld [vmem:[#allocation5 + $0x2e8] sm:$0xff]  ;;  %v192_v13 = vld [vmem:[#allocation5 + $0x360] sm:$0xff] }
  0x2f   :  { %504 = vmatpush.msra.mxu3 %v136_v48  ;;  %485 = vmatpush.msra.mxu2 %v119_v50  ;;  %v209_v14 = vld [vmem:[#allocation5 + $0x3e8] sm:$0xff]  ;;  %v159_v15 = vld [vmem:[#allocation5 + $0x258] sm:$0xff]  ;;  %v176_v16 = vld [vmem:[#allocation5 + $0x2e0] sm:$0xff] }
  0x30   :  { %465 = vmatpush.msra.mxu1 %v103_v51  ;;  %446 = vmatpush.msra.mxu0 %v86_v53  ;;  %v191_v17 = vld [vmem:[#allocation5 + $0x358] sm:$0xff]  ;;  %v208_v18 = vld [vmem:[#allocation5 + $0x3e0] sm:$0xff]  ;;  %v158_v19 = vld [vmem:[#allocation5 + $0x250] sm:$0xff] }
  0x31   :  { %505 = vmatpush.msra.mxu3 %v135_v52  ;;  %486 = vmatpush.msra.mxu2 %v118_v54  ;;  %v175_v20 = vld [vmem:[#allocation5 + $0x2d8] sm:$0xff]  ;;  %v190_v21 = vld [vmem:[#allocation5 + $0x350] sm:$0xff]  ;;  %v157_v24 = vld [vmem:[#allocation5 + $0x248] sm:$0xff] }
  0x32   :  { %466 = vmatpush.msra.mxu1 %v102_v55  ;;  %447 = vmatpush.msra.mxu0 %v85_v57  ;;  %v207_v22 = vld [vmem:[#allocation5 + $0x3d8] sm:$0xff]  ;;  %v174_v25 = vld [vmem:[#allocation5 + $0x2d0] sm:$0xff]  ;;  %v189_v26 = vld [vmem:[#allocation5 + $0x348] sm:$0xff] }
  0x33   :  { %506 = vmatpush.msra.mxu3 %v134_v56  ;;  %487 = vmatpush.msra.mxu2 %v117_v58  ;;  %v79_v23 = vld [vmem:[#allocation3] sm:$0xff]  ;;  %v206_v27 = vld [vmem:[#allocation5 + $0x3d0] sm:$0xff]  ;;  %v173_v29 = vld [vmem:[#allocation5 + $0x2c8] sm:$0xff] }
  0x34   :  { %467 = vmatpush.msra.mxu1 %v101_v59  ;;  %448 = vmatpush.msra.mxu0 %v84_v61  ;;  %387 = vst [vmem:[#allocation1] ss:$4 sm:$0xff] %v79_v23  ;;  %v156_v28 = vld [vmem:[#allocation5 + $0x240] sm:$0xff]  ;;  %v205_v31 = vld [vmem:[#allocation5 + $0x3c8] sm:$0xff]  ;;  %v155_v32 = vld [vmem:[#allocation5 + $0x238] sm:$0xff] }
  0x35   :  { %507 = vmatpush.msra.mxu3 %v133_v60  ;;  %488 = vmatpush.msra.mxu2 %v116_v62  ;;  %v188_v30 = vld [vmem:[#allocation5 + $0x340] sm:$0xff]  ;;  %v187_v34 = vld [vmem:[#allocation5 + $0x338] sm:$0xff]  ;;  %v154_v36 = vld [vmem:[#allocation5 + $0x230] sm:$0xff] }
  0x36   :  { %513 = vmatpush.msrb.mxu0 %v163_v63  ;;  %468 = vmatpush.msra.mxu1 %v100_v1  ;;  %v172_v33 = vld [vmem:[#allocation5 + $0x2c0] sm:$0xff]  ;;  %v171_v37 = vld [vmem:[#allocation5 + $0x2b8] sm:$0xff]  ;;  %v186_v38 = vld [vmem:[#allocation5 + $0x330] sm:$0xff] }
  0x37   :  { %553 = vmatpush.msrb.mxu2 %v195_v0  ;;  %508 = vmatpush.msra.mxu3 %v132_v2  ;;  %v204_v35 = vld [vmem:[#allocation5 + $0x3c0] sm:$0xff]  ;;  %v203_v39 = vld [vmem:[#allocation5 + $0x3b8] sm:$0xff]  ;;  %v153_v41 = vld [vmem:[#allocation5 + $0x228] sm:$0xff] }
  0x38   :  { %514 = vmatpush.msrb.mxu0 %v162_v3  ;;  %533 = vmatpush.msrb.mxu1 %v179_v4  ;;  %v80_v40 = vld [vmem:[#allocation3 + $0x8] sm:$0xff]  ;;  %v170_v42 = vld [vmem:[#allocation5 + $0x2b0] sm:$0xff]  ;;  %v151_v54 = vld [vmem:[#allocation5 + $0x218] sm:$0xff] }
  0x39   :  { %554 = vmatpush.msrb.mxu2 %v194_v5  ;;  %573 = vmatpush.msrb.mxu3 %v211_v6  ;;  %v81_v43 = vld [vmem:[#allocation3 + $0x10] sm:$0xff]  ;;  %389 = vst [vmem:[#allocation1 + $0x20] ss:$4 sm:$0xff] %v80_v40  ;;  %v152_v50 = vld [vmem:[#allocation5 + $0x220] sm:$0xff]  ;;  %v183_v56 = vld [vmem:[#allocation5 + $0x318] sm:$0xff] }
  0x3a   :  { %515 = vmatpush.msrb.mxu0 %v161_v7  ;;  %534 = vmatpush.msrb.mxu1 %v178_v8  ;;  %v185_v44 = vld [vmem:[#allocation5 + $0x328] sm:$0xff]  ;;  %v202_v49 = vld [vmem:[#allocation5 + $0x3b0] sm:$0xff]  ;;  %v184_v52 = vld [vmem:[#allocation5 + $0x320] sm:$0xff] }
  0x3b   :  { %555 = vmatpush.msrb.mxu2 %v193_v9  ;;  %574 = vmatpush.msrb.mxu3 %v210_v10  ;;  %v392_v45 = vld.sshfl [vmem:[#allocation1 + $0x10] sm:$0xff pattern:$0x73625140]  ;;  %v1024_v46 = vld.sshfl [vmem:[#allocation1] sm:$0xff pattern:$0x73625140] }
  0x3c   :  { %516 = vmatpush.msrb.mxu0 %v160_v11  ;;  %535 = vmatpush.msrb.mxu1 %v177_v12  ;;  %v1026_v47 = vld.sshfl [vmem:[#allocation1 + $0x18] sm:$0xff pattern:$0x73625140]  ;;  %v1028_v48 = vld.sshfl [vmem:[#allocation1 + $0x8] sm:$0xff pattern:$0x73625140] }
  0x3d   :  { %556 = vmatpush.msrb.mxu2 %v192_v13  ;;  %575 = vmatpush.msrb.mxu3 %v209_v14  ;;  %v169_v51 = vld [vmem:[#allocation5 + $0x2a8] sm:$0xff]  ;;  %398 = vst [vmem:[#allocation1] ss:$4 sm:$0xff] %v81_v43  ;;  %v168_v55 = vld [vmem:[#allocation5 + $0x2a0] sm:$0xff]  ;;  %v150_v58 = vld [vmem:[#allocation5 + $0x210] sm:$0xff] }
  0x3e   :  { %517 = vmatpush.msrb.mxu0 %v159_v15  ;;  %536 = vmatpush.msrb.mxu1 %v176_v16  ;;  %v201_v53 = vld [vmem:[#allocation5 + $0x3a8] sm:$0xff]  ;;  %v200_v57 = vld [vmem:[#allocation5 + $0x3a0] sm:$0xff]  ;;  %v167_v59 = vld [vmem:[#allocation5 + $0x298] sm:$0xff] }
  0x3f   :  { %557 = vmatpush.msrb.mxu2 %v191_v17  ;;  %576 = vmatpush.msrb.mxu3 %v208_v18  ;;  %v82_v60 = vld [vmem:[#allocation3 + $0x18] sm:$0xff]  ;;  %v149_v3 = vld [vmem:[#allocation5 + $0x208] sm:$0xff]  ;;  %v148_v7 = vld [vmem:[#allocation5 + $0x200] sm:$0xff] }
  0x40   :  { %518 = vmatpush.msrb.mxu0 %v158_v19  ;;  %537 = vmatpush.msrb.mxu1 %v175_v20  ;;  %v1030_v61 = vld.sshfl [vmem:[#allocation1 + $0x30] sm:$0xff pattern:$0x73625140]  ;;  %v1032_v62 = vld.sshfl [vmem:[#allocation1 + $0x20] sm:$0xff pattern:$0x73625140] }
  0x41   :  { %558 = vmatpush.msrb.mxu2 %v190_v21  ;;  %577 = vmatpush.msrb.mxu3 %v207_v22  ;;  %v1034_v63 = vld.sshfl [vmem:[#allocation1 + $0x38] sm:$0xff pattern:$0x73625140]  ;;  %v1036_v0 = vld.sshfl [vmem:[#allocation1 + $0x28] sm:$0xff pattern:$0x73625140] }
  0x42   :  { %519 = vmatpush.msrb.mxu0 %v157_v24  ;;  %538 = vmatpush.msrb.mxu1 %v174_v25  ;;  %v182_v1 = vld [vmem:[#allocation5 + $0x310] sm:$0xff]  ;;  %v199_v2 = vld [vmem:[#allocation5 + $0x398] sm:$0xff]  ;;  %399 = vst [vmem:[#allocation1 + $0x20] ss:$4 sm:$0xff] %v82_v60  ;;  %v181_v5 = vld [vmem:[#allocation5 + $0x308] sm:$0xff] }
  0x43   :  { %559 = vmatpush.msrb.mxu2 %v189_v26  ;;  %578 = vmatpush.msrb.mxu3 %v206_v27  ;;  %v166_v4 = vld [vmem:[#allocation5 + $0x290] sm:$0xff]  ;;  %v165_v8 = vld [vmem:[#allocation5 + $0x288] sm:$0xff]  ;;  %v180_v9 = vld [vmem:[#allocation5 + $0x300] sm:$0xff] }
  0x44   :  { %520 = vmatpush.msrb.mxu0 %v156_v28  ;;  %539 = vmatpush.msrb.mxu1 %v173_v29  ;;  %v198_v6 = vld [vmem:[#allocation5 + $0x390] sm:$0xff]  ;;  %v197_v10 = vld [vmem:[#allocation5 + $0x388] sm:$0xff]  ;;  %v227_v11 = vld [vmem:[#allocation5 + $0x478] sm:$0xff] }
  0x45   :  { %560 = vmatpush.msrb.mxu2 %v188_v30  ;;  %579 = vmatpush.msrb.mxu3 %v205_v31  ;;  %v259_v12 = vld [vmem:[#allocation5 + $0x578] sm:$0xff]  ;;  %v164_v13 = vld [vmem:[#allocation5 + $0x280] sm:$0xff]  ;;  %v226_v15 = vld [vmem:[#allocation5 + $0x470] sm:$0xff] }
  0x46   :  { %521 = vmatpush.msrb.mxu0 %v155_v32  ;;  %540 = vmatpush.msrb.mxu1 %v172_v33  ;;  %v196_v14 = vld [vmem:[#allocation5 + $0x380] sm:$0xff]  ;;  %v243_v16 = vld [vmem:[#allocation5 + $0x4f8] sm:$0xff]  ;;  %v258_v17 = vld [vmem:[#allocation5 + $0x570] sm:$0xff] }
  0x47   :  { %561 = vmatpush.msrb.mxu2 %v187_v34  ;;  %580 = vmatpush.msrb.mxu3 %v204_v35  ;;  %v275_v18 = vld [vmem:[#allocation5 + $0x5f8] sm:$0xff]  ;;  %v225_v19 = vld [vmem:[#allocation5 + $0x468] sm:$0xff]  ;;  %v242_v20 = vld [vmem:[#allocation5 + $0x4f0] sm:$0xff] }
  0x48   :  { %522 = vmatpush.msrb.mxu0 %v154_v36  ;;  %541 = vmatpush.msrb.mxu1 %v171_v37  ;;  %v257_v21 = vld [vmem:[#allocation5 + $0x568] sm:$0xff]  ;;  %v274_v22 = vld [vmem:[#allocation5 + $0x5f0] sm:$0xff]  ;;  %v224_v23 = vld [vmem:[#allocation5 + $0x460] sm:$0xff] }
  0x49   :  { %562 = vmatpush.msrb.mxu2 %v186_v38  ;;  %581 = vmatpush.msrb.mxu3 %v203_v39  ;;  %v241_v24 = vld [vmem:[#allocation5 + $0x4e8] sm:$0xff]  ;;  %v256_v25 = vld [vmem:[#allocation5 + $0x560] sm:$0xff]  ;;  %v1041_v26 = vld.sshfl [vmem:[#allocation1] sm:$0xff pattern:$0x73625140] }
  0x4a   :  { %523 = vmatpush.msrb.mxu0 %v153_v41  ;;  %542 = vmatpush.msrb.mxu1 %v170_v42  ;;  %v1043_v27 = vld.sshfl [vmem:[#allocation1 + $0x10] sm:$0xff pattern:$0x73625140]  ;;  %v1045_v28 = vld.sshfl [vmem:[#allocation1 + $0x8] sm:$0xff pattern:$0x73625140] }
  0x4b   :  { %563 = vmatpush.msrb.mxu2 %v185_v44  ;;  %582 = vmatpush.msrb.mxu3 %v202_v49  ;;  %v273_v29 = vld [vmem:[#allocation5 + $0x5e8] sm:$0xff]  ;;  %v83_v30 = vld [vmem:[#allocation3 + $0x20] sm:$0x3f]  ;;  %v240_v33 = vld [vmem:[#allocation5 + $0x4e0] sm:$0xff] }
  0x4c   :  { %524 = vmatpush.msrb.mxu0 %v152_v50  ;;  %543 = vmatpush.msrb.mxu1 %v169_v51  ;;  %v1047_v31 = vld.sshfl [vmem:[#allocation1 + $0x18] sm:$0xff pattern:$0x73625140]  ;;  %v223_v32 = vld [vmem:[#allocation5 + $0x458] sm:$0xff]  ;;  %v272_v35 = vld [vmem:[#allocation5 + $0x5e0] sm:$0xff] }
  0x4d   :  { %564 = vmatpush.msrb.mxu2 %v184_v52  ;;  %583 = vmatpush.msrb.mxu3 %v201_v53  ;;  %408 = vst [vmem:[#allocation1] ss:$4 sm:$0xff] %v83_v30  ;;  %v255_v34 = vld [vmem:[#allocation5 + $0x558] sm:$0xff]  ;;  %v222_v36 = vld [vmem:[#allocation5 + $0x450] sm:$0xff]  ;;  %v221_v40 = vld [vmem:[#allocation5 + $0x448] sm:$0xff] }
  0x4e   :  { %525 = vmatpush.msrb.mxu0 %v151_v54  ;;  %544 = vmatpush.msrb.mxu1 %v168_v55  ;;  %v239_v37 = vld [vmem:[#allocation5 + $0x4d8] sm:$0xff]  ;;  %v254_v38 = vld [vmem:[#allocation5 + $0x550] sm:$0xff]  ;;  %v253_v42 = vld [vmem:[#allocation5 + $0x548] sm:$0xff] }
  0x4f   :  { %565 = vmatpush.msrb.mxu2 %v183_v56  ;;  %584 = vmatpush.msrb.mxu3 %v200_v57  ;;  %v271_v39 = vld [vmem:[#allocation5 + $0x5d8] sm:$0xff]  ;;  %v238_v41 = vld [vmem:[#allocation5 + $0x4d0] sm:$0xff]  ;;  %v220_v44 = vld [vmem:[#allocation5 + $0x440] sm:$0xff] }
  0x50   :  { %526 = vmatpush.msrb.mxu0 %v150_v58  ;;  %545 = vmatpush.msrb.mxu1 %v167_v59  ;;  %v270_v43 = vld [vmem:[#allocation5 + $0x5d0] sm:$0xff]  ;;  %v236_v49 = vld [vmem:[#allocation5 + $0x4c0] sm:$0xff]  ;;  %v251_v50 = vld [vmem:[#allocation5 + $0x538] sm:$0xff] }
  0x51   :  { %566 = vmatpush.msrb.mxu2 %v182_v1  ;;  %585 = vmatpush.msrb.mxu3 %v199_v2  ;;  %v268_v51 = vld [vmem:[#allocation5 + $0x5c0] sm:$0xff]  ;;  %v218_v52 = vld [vmem:[#allocation5 + $0x430] sm:$0xff]  ;;  %v235_v53 = vld [vmem:[#allocation5 + $0x4b8] sm:$0xff] }
  0x52   :  { %527 = vmatpush.msrb.mxu0 %v149_v3  ;;  %546 = vmatpush.msrb.mxu1 %v166_v4  ;;  %v250_v54 = vld [vmem:[#allocation5 + $0x530] sm:$0xff]  ;;  %v267_v55 = vld [vmem:[#allocation5 + $0x5b8] sm:$0xff]  ;;  %v217_v56 = vld [vmem:[#allocation5 + $0x428] sm:$0xff] }
  0x53   :  { %567 = vmatpush.msrb.mxu2 %v181_v5  ;;  %586 = vmatpush.msrb.mxu3 %v198_v6  ;;  %v234_v57 = vld [vmem:[#allocation5 + $0x4b0] sm:$0xff]  ;;  %v249_v58 = vld [vmem:[#allocation5 + $0x528] sm:$0xff]  ;;  %v216_v60 = vld [vmem:[#allocation5 + $0x420] sm:$0xff] }
  0x54   :  { %489 = vmatmul.f32.vlgmr.msra.gmra.mxu2 %v392_v45  ;;  %528 = vmatpush.msrb.mxu0 %v148_v7  ;;  %v237_v45 = vld [vmem:[#allocation5 + $0x4c8] sm:$0xff]  ;;  %v266_v59 = vld [vmem:[#allocation5 + $0x5b0] sm:$0xff]  ;;  %v232_v1 = vld [vmem:[#allocation5 + $0x4a0] sm:$0xff] }
  0x55   :  { %547 = vmatpush.msrb.mxu1 %v165_v8  ;;  %568 = vmatpush.msrb.mxu2 %v180_v9  ;;  %v247_v2 = vld [vmem:[#allocation5 + $0x518] sm:$0xff]  ;;  %v264_v3 = vld [vmem:[#allocation5 + $0x5a0] sm:$0xff]  ;;  %v214_v4 = vld [vmem:[#allocation5 + $0x410] sm:$0xff] }
  0x56   :  { %587 = vmatpush.msrb.mxu3 %v197_v10  ;;  %449 = vmatmul.f32.vlgmr.msra.gmra.mxu0 %v1024_v46  ;;  %v252_v46 = vld [vmem:[#allocation5 + $0x540] sm:$0xff]  ;;  %v231_v5 = vld [vmem:[#allocation5 + $0x498] sm:$0xff]  ;;  %v246_v6 = vld [vmem:[#allocation5 + $0x510] sm:$0xff] }
  0x57   :  { %509 = vmatmul.f32.vlgmr.msra.gmra.mxu3 %v1026_v47  ;;  %593 = vmatpush.msra.mxu0 %v227_v11  ;;  %v269_v47 = vld [vmem:[#allocation5 + $0x5c8] sm:$0xff]  ;;  %v263_v7 = vld [vmem:[#allocation5 + $0x598] sm:$0xff]  ;;  %v230_v9 = vld [vmem:[#allocation5 + $0x490] sm:$0xff] }
  0x58   :  { %633 = vmatpush.msra.mxu2 %v259_v12  ;;  %548 = vmatpush.msrb.mxu1 %v164_v13  ;;  %v213_v8 = vld [vmem:[#allocation5 + $0x408] sm:$0xff]  ;;  %v262_v11 = vld [vmem:[#allocation5 + $0x590] sm:$0xff]  ;;  %v212_v12 = vld [vmem:[#allocation5 + $0x400] sm:$0xff] }
  0x59   :  { %588 = vmatpush.msrb.mxu3 %v196_v14  ;;  %469 = vmatmul.f32.vlgmr.msra.gmra.mxu1 %v1028_v48  ;;  %v219_v48 = vld [vmem:[#allocation5 + $0x438] sm:$0xff]  ;;  %v245_v10 = vld [vmem:[#allocation5 + $0x508] sm:$0xff]  ;;  %v244_v14 = vld [vmem:[#allocation5 + $0x500] sm:$0xff] }
  0x5a   :  { %594 = vmatpush.msra.mxu0 %v226_v15  ;;  %613 = vmatpush.msra.mxu1 %v243_v16  ;;  %v229_v13 = vld [vmem:[#allocation5 + $0x488] sm:$0xff]  ;;  %v291_v16 = vld [vmem:[#allocation5 + $0x678] sm:$0xff] }
  0x5b   :  { %634 = vmatpush.msra.mxu2 %v258_v17  ;;  %653 = vmatpush.msra.mxu3 %v275_v18  ;;  %v261_v15 = vld [vmem:[#allocation5 + $0x588] sm:$0xff]  ;;  %v323_v17 = vld [vmem:[#allocation5 + $0x778] sm:$0xff]  ;;  %v228_v18 = vld [vmem:[#allocation5 + $0x480] sm:$0xff] }
  0x5c   :  { %595 = vmatpush.msra.mxu0 %v225_v19  ;;  %614 = vmatpush.msra.mxu1 %v242_v20  ;;  %v260_v19 = vld [vmem:[#allocation5 + $0x580] sm:$0xff]  ;;  %v290_v20 = vld [vmem:[#allocation5 + $0x670] sm:$0xff]  ;;  %v305_v30 = vld [vmem:[#allocation5 + $0x6e8] sm:$0xff] }
  0x5d   :  { %635 = vmatpush.msra.mxu2 %v257_v21  ;;  %654 = vmatpush.msra.mxu3 %v274_v22  ;;  %v307_v21 = vld [vmem:[#allocation5 + $0x6f8] sm:$0xff]  ;;  %v322_v22 = vld [vmem:[#allocation5 + $0x770] sm:$0xff] }
  0x5e   :  { %569 = vmatmul.f32.vlgmr.msrb.gmra.mxu2 %v1030_v61  ;;  %596 = vmatpush.msra.mxu0 %v224_v23  ;;  %v233_v61 = vld [vmem:[#allocation5 + $0x4a8] sm:$0xff]  ;;  %v339_v23 = vld [vmem:[#allocation5 + $0x7f8] sm:$0xff] }
  0x5f   :  { %615 = vmatpush.msra.mxu1 %v241_v24  ;;  %636 = vmatpush.msra.mxu2 %v256_v25  ;;  %v289_v24 = vld [vmem:[#allocation5 + $0x668] sm:$0xff]  ;;  %v306_v25 = vld [vmem:[#allocation5 + $0x6f0] sm:$0xff] }
  0x60   :  { %655 = vmatpush.msra.mxu3 %v273_v29  ;;  %529 = vmatmul.f32.vlgmr.msrb.gmra.mxu0 %v1032_v62  ;;  %v248_v62 = vld [vmem:[#allocation5 + $0x520] sm:$0xff]  ;;  %v321_v29 = vld [vmem:[#allocation5 + $0x768] sm:$0xff] }
  0x61   :  { %589 = vmatmul.f32.vlgmr.msrb.gmra.mxu3 %v1034_v63  ;;  %597 = vmatpush.msra.mxu0 %v223_v32  ;;  %v265_v63 = vld [vmem:[#allocation5 + $0x5a8] sm:$0xff]  ;;  %v320_v32 = vld [vmem:[#allocation5 + $0x760] sm:$0xff] }
  0x62   :  { %616 = vmatpush.msra.mxu1 %v240_v33  ;;  %637 = vmatpush.msra.mxu2 %v255_v34  ;;  %v337_v33 = vld [vmem:[#allocation5 + $0x7e8] sm:$0xff]  ;;  %v287_v34 = vld [vmem:[#allocation5 + $0x658] sm:$0xff] }
  0x63   :  { %656 = vmatpush.msra.mxu3 %v272_v35  ;;  %549 = vmatmul.f32.vlgmr.msrb.gmra.mxu1 %v1036_v0  ;;  %v215_v0 = vld [vmem:[#allocation5 + $0x418] sm:$0xff]  ;;  %v336_v35 = vld [vmem:[#allocation5 + $0x7e0] sm:$0xff] }
  0x64   :  { %598 = vmatpush.msra.mxu0 %v222_v36  ;;  %617 = vmatpush.msra.mxu1 %v239_v37  ;;  %v286_v36 = vld [vmem:[#allocation5 + $0x650] sm:$0xff]  ;;  %v303_v37 = vld [vmem:[#allocation5 + $0x6d8] sm:$0xff] }
  0x65   :  { %638 = vmatpush.msra.mxu2 %v254_v38  ;;  %657 = vmatpush.msra.mxu3 %v271_v39  ;;  %v318_v38 = vld [vmem:[#allocation5 + $0x750] sm:$0xff]  ;;  %v335_v39 = vld [vmem:[#allocation5 + $0x7d8] sm:$0xff] }
  0x66   :  { %599 = vmatpush.msra.mxu0 %v221_v40  ;;  %618 = vmatpush.msra.mxu1 %v238_v41  ;;  %v285_v40 = vld [vmem:[#allocation5 + $0x648] sm:$0xff]  ;;  %v302_v41 = vld [vmem:[#allocation5 + $0x6d0] sm:$0xff] }
  0x67   :  { %639 = vmatpush.msra.mxu2 %v253_v42  ;;  %658 = vmatpush.msra.mxu3 %v270_v43  ;;  %v317_v42 = vld [vmem:[#allocation5 + $0x748] sm:$0xff]  ;;  %v334_v43 = vld [vmem:[#allocation5 + $0x7d0] sm:$0xff] }
  0x68   :  { %600 = vmatpush.msra.mxu0 %v220_v44  ;;  %619 = vmatpush.msra.mxu1 %v237_v45  ;;  %v284_v44 = vld [vmem:[#allocation5 + $0x640] sm:$0xff]  ;;  %v301_v45 = vld [vmem:[#allocation5 + $0x6c8] sm:$0xff] }
  0x69   :  { %640 = vmatpush.msra.mxu2 %v252_v46  ;;  %659 = vmatpush.msra.mxu3 %v269_v47  ;;  %v316_v46 = vld [vmem:[#allocation5 + $0x740] sm:$0xff]  ;;  %v333_v47 = vld [vmem:[#allocation5 + $0x7c8] sm:$0xff] }
  0x6a   :  { %601 = vmatpush.msra.mxu0 %v219_v48  ;;  %620 = vmatpush.msra.mxu1 %v236_v49  ;;  %v283_v48 = vld [vmem:[#allocation5 + $0x638] sm:$0xff]  ;;  %v300_v49 = vld [vmem:[#allocation5 + $0x6c0] sm:$0xff] }
  0x6b   :  { %641 = vmatpush.msra.mxu2 %v251_v50  ;;  %660 = vmatpush.msra.mxu3 %v268_v51  ;;  %v315_v50 = vld [vmem:[#allocation5 + $0x738] sm:$0xff]  ;;  %v332_v51 = vld [vmem:[#allocation5 + $0x7c0] sm:$0xff] }
  0x6c   :  { %602 = vmatpush.msra.mxu0 %v218_v52  ;;  %621 = vmatpush.msra.mxu1 %v235_v53  ;;  %v282_v52 = vld [vmem:[#allocation5 + $0x630] sm:$0xff]  ;;  %v299_v53 = vld [vmem:[#allocation5 + $0x6b8] sm:$0xff] }
  0x6d   :  { %642 = vmatpush.msra.mxu2 %v250_v54  ;;  %661 = vmatpush.msra.mxu3 %v267_v55  ;;  %v314_v54 = vld [vmem:[#allocation5 + $0x730] sm:$0xff]  ;;  %v331_v55 = vld [vmem:[#allocation5 + $0x7b8] sm:$0xff] }
  0x6e   :  { %603 = vmatpush.msra.mxu0 %v217_v56  ;;  %622 = vmatpush.msra.mxu1 %v234_v57  ;;  %v281_v56 = vld [vmem:[#allocation5 + $0x628] sm:$0xff]  ;;  %v298_v57 = vld [vmem:[#allocation5 + $0x6b0] sm:$0xff] }
  0x6f   :  { %643 = vmatpush.msra.mxu2 %v249_v58  ;;  %662 = vmatpush.msra.mxu3 %v266_v59  ;;  %v313_v58 = vld [vmem:[#allocation5 + $0x728] sm:$0xff]  ;;  %v330_v59 = vld [vmem:[#allocation5 + $0x7b0] sm:$0xff] }
  0x70   :  { %604 = vmatpush.msra.mxu0 %v216_v60  ;;  %623 = vmatpush.msra.mxu1 %v233_v61  ;;  %v280_v60 = vld [vmem:[#allocation5 + $0x620] sm:$0xff]  ;;  %v297_v61 = vld [vmem:[#allocation5 + $0x6a8] sm:$0xff] }
  0x71   :  { %644 = vmatpush.msra.mxu2 %v248_v62  ;;  %663 = vmatpush.msra.mxu3 %v265_v63  ;;  %v312_v62 = vld [vmem:[#allocation5 + $0x720] sm:$0xff]  ;;  %v329_v63 = vld [vmem:[#allocation5 + $0x7a8] sm:$0xff] }
  0x72   :  { %605 = vmatpush.msra.mxu0 %v215_v0  ;;  %624 = vmatpush.msra.mxu1 %v232_v1  ;;  %v279_v0 = vld [vmem:[#allocation5 + $0x618] sm:$0xff]  ;;  %v296_v1 = vld [vmem:[#allocation5 + $0x6a0] sm:$0xff] }
  0x73   :  { %645 = vmatpush.msra.mxu2 %v247_v2  ;;  %664 = vmatpush.msra.mxu3 %v264_v3  ;;  %v311_v2 = vld [vmem:[#allocation5 + $0x718] sm:$0xff]  ;;  %v328_v3 = vld [vmem:[#allocation5 + $0x7a0] sm:$0xff] }
  0x74   :  { %606 = vmatpush.msra.mxu0 %v214_v4  ;;  %625 = vmatpush.msra.mxu1 %v231_v5  ;;  %v278_v4 = vld [vmem:[#allocation5 + $0x610] sm:$0xff]  ;;  %v295_v5 = vld [vmem:[#allocation5 + $0x698] sm:$0xff] }
  0x75   :  { %646 = vmatpush.msra.mxu2 %v246_v6  ;;  %665 = vmatpush.msra.mxu3 %v263_v7  ;;  %v310_v6 = vld [vmem:[#allocation5 + $0x710] sm:$0xff]  ;;  %v327_v7 = vld [vmem:[#allocation5 + $0x798] sm:$0xff] }
  0x76   :  { %607 = vmatpush.msra.mxu0 %v213_v8  ;;  %626 = vmatpush.msra.mxu1 %v230_v9  ;;  %v277_v8 = vld [vmem:[#allocation5 + $0x608] sm:$0xff]  ;;  %v294_v9 = vld [vmem:[#allocation5 + $0x690] sm:$0xff] }
  0x77   :  { %647 = vmatpush.msra.mxu2 %v245_v10  ;;  %666 = vmatpush.msra.mxu3 %v262_v11  ;;  %v309_v10 = vld [vmem:[#allocation5 + $0x708] sm:$0xff]  ;;  %v326_v11 = vld [vmem:[#allocation5 + $0x790] sm:$0xff] }
  0x78   :  { %608 = vmatpush.msra.mxu0 %v212_v12  ;;  %627 = vmatpush.msra.mxu1 %v229_v13  ;;  %v276_v12 = vld [vmem:[#allocation5 + $0x600] sm:$0xff]  ;;  %v293_v13 = vld [vmem:[#allocation5 + $0x688] sm:$0xff] }
  0x79   :  { %648 = vmatpush.msra.mxu2 %v244_v14  ;;  %667 = vmatpush.msra.mxu3 %v261_v15  ;;  %v308_v14 = vld [vmem:[#allocation5 + $0x700] sm:$0xff]  ;;  %v325_v15 = vld [vmem:[#allocation5 + $0x788] sm:$0xff] }
  0x7a   :  { %609 = vmatmul.f32.vlgmr.msra.gmra.mxu0 %v1041_v26  ;;  %649 = vmatmul.f32.vlgmr.msra.gmra.mxu2 %v1043_v27  ;;  %v338_v26 = vld [vmem:[#allocation5 + $0x7f0] sm:$0xff]  ;;  %v288_v27 = vld [vmem:[#allocation5 + $0x660] sm:$0xff] }
  0x7b   :  { %673 = vmatpush.msrb.mxu0 %v291_v16  ;;  %713 = vmatpush.msrb.mxu2 %v323_v17  ;;  %v404_v16 = vld.sshfl [vmem:[#allocation1 + $0x20] sm:$0xff pattern:$0x73625140]  ;;  %v406_v17 = vld.sshfl [vmem:[#allocation1 + $0x30] sm:$0xff pattern:$0x73625140] }
  0x7c   :  { %628 = vmatpush.msra.mxu1 %v228_v18  ;;  %668 = vmatpush.msra.mxu3 %v260_v19  ;;  %v355_v18 = vld [vmem:[#allocation5 + $0x878] sm:$0xff]  ;;  %v292_v19 = vld [vmem:[#allocation5 + $0x680] sm:$0xff] }
  0x7d   :  { %629 = vmatmul.f32.vlgmr.msra.gmra.mxu1 %v1045_v28  ;;  %669 = vmatmul.f32.vlgmr.msra.gmra.mxu3 %v1047_v31  ;;  %v304_v28 = vld [vmem:[#allocation5 + $0x6e0] sm:$0xff]  ;;  %v319_v31 = vld [vmem:[#allocation5 + $0x758] sm:$0xff] }
  0x7e   :  { %674 = vmatpush.msrb.mxu0 %v290_v20  ;;  %693 = vmatpush.msrb.mxu1 %v307_v21  ;;  %v324_v20 = vld [vmem:[#allocation5 + $0x780] sm:$0xff] }
  0x7f   :  { %714 = vmatpush.msrb.mxu2 %v322_v22  ;;  %733 = vmatpush.msrb.mxu3 %v339_v23  ;;  %v405_v21 = vld.sshfl [vmem:[#allocation1 + $0x28] sm:$0xff pattern:$0x73625140]  ;;  %v407_v22 = vld.sshfl [vmem:[#allocation1 + $0x38] sm:$0xff pattern:$0x73625140] }
  0x80   :  { %675 = vmatpush.msrb.mxu0 %v289_v24  ;;  %694 = vmatpush.msrb.mxu1 %v306_v25  ;;  %v354_v23 = vld [vmem:[#allocation5 + $0x870] sm:$0xff]  ;;  %v371_v24 = vld [vmem:[#allocation5 + $0x8f8] sm:$0xff]  ;;  %v377_v25 = vld [vmem:[#allocation5 + $0x928] sm:$0xff] }
  0x81   :  { %715 = vmatpush.msrb.mxu2 %v321_v29  ;;  %734 = vmatpush.msrb.mxu3 %v338_v26  ;;  %v353_v29 = vld [vmem:[#allocation5 + $0x868] sm:$0xff]  ;;  %v370_v26 = vld [vmem:[#allocation5 + $0x8f0] sm:$0xff] }
  0x82   :  { %676 = vmatpush.msrb.mxu0 %v288_v27  ;;  %695 = vmatpush.msrb.mxu1 %v305_v30  ;;  %v376_v27 = vld [vmem:[#allocation5 + $0x920] sm:$0xff] }
  0x83   :  { %716 = vmatpush.msrb.mxu2 %v320_v32  ;;  %735 = vmatpush.msrb.mxu3 %v337_v33  ;;  %v352_v30 = vld [vmem:[#allocation5 + $0x860] sm:$0xff]  ;;  %v369_v32 = vld [vmem:[#allocation5 + $0x8e8] sm:$0xff]  ;;  %v375_v33 = vld [vmem:[#allocation5 + $0x918] sm:$0xff] }
  0x84   :  { %677 = vmatpush.msrb.mxu0 %v287_v34  ;;  %696 = vmatpush.msrb.mxu1 %v304_v28  ;;  %v351_v34 = vld [vmem:[#allocation5 + $0x858] sm:$0xff]  ;;  %v368_v28 = vld [vmem:[#allocation5 + $0x8e0] sm:$0xff] }
  0x85   :  { %717 = vmatpush.msrb.mxu2 %v319_v31  ;;  %736 = vmatpush.msrb.mxu3 %v336_v35  ;;  %v374_v31 = vld [vmem:[#allocation5 + $0x910] sm:$0xff] }
  0x86   :  { %678 = vmatpush.msrb.mxu0 %v286_v36  ;;  %697 = vmatpush.msrb.mxu1 %v303_v37  ;;  %v350_v35 = vld [vmem:[#allocation5 + $0x850] sm:$0xff]  ;;  %v367_v36 = vld [vmem:[#allocation5 + $0x8d8] sm:$0xff]  ;;  %v373_v37 = vld [vmem:[#allocation5 + $0x908] sm:$0xff] }
  0x87   :  { %718 = vmatpush.msrb.mxu2 %v318_v38  ;;  %737 = vmatpush.msrb.mxu3 %v335_v39  ;;  %v349_v38 = vld [vmem:[#allocation5 + $0x848] sm:$0xff]  ;;  %v366_v39 = vld [vmem:[#allocation5 + $0x8d0] sm:$0xff] }
  0x88   :  { %679 = vmatpush.msrb.mxu0 %v285_v40  ;;  %698 = vmatpush.msrb.mxu1 %v302_v41  ;;  %v372_v40 = vld [vmem:[#allocation5 + $0x900] sm:$0xff] }
  0x89   :  { %719 = vmatpush.msrb.mxu2 %v317_v42  ;;  %738 = vmatpush.msrb.mxu3 %v334_v43  ;;  %v348_v41 = vld [vmem:[#allocation5 + $0x840] sm:$0xff]  ;;  %v365_v43 = vld [vmem:[#allocation5 + $0x8c8] sm:$0xff] }
  0x8a   :  { %680 = vmatpush.msrb.mxu0 %v284_v44  ;;  %699 = vmatpush.msrb.mxu1 %v301_v45  ;;  %v411_v42 = vld.sshfl [vmem:[#allocation1 + $0x10] sm:$0xff pattern:$0x73625140]  ;;  %v347_v44 = vld [vmem:[#allocation5 + $0x838] sm:$0xff] }
  0x8b   :  { %720 = vmatpush.msrb.mxu2 %v316_v46  ;;  %739 = vmatpush.msrb.mxu3 %v333_v47  ;;  %v364_v45 = vld [vmem:[#allocation5 + $0x8c0] sm:$0xff]  ;;  %v346_v46 = vld [vmem:[#allocation5 + $0x830] sm:$0xff]  ;;  %v363_v47 = vld [vmem:[#allocation5 + $0x8b8] sm:$0xff] }
  0x8c   :  { %681 = vmatpush.msrb.mxu0 %v283_v48  ;;  %700 = vmatpush.msrb.mxu1 %v300_v49  ;;  %v345_v48 = vld [vmem:[#allocation5 + $0x828] sm:$0xff]  ;;  %v362_v49 = vld [vmem:[#allocation5 + $0x8b0] sm:$0xff] }
  0x8d   :  { %721 = vmatpush.msrb.mxu2 %v315_v50  ;;  %740 = vmatpush.msrb.mxu3 %v332_v51  ;;  %v344_v50 = vld [vmem:[#allocation5 + $0x820] sm:$0xff]  ;;  %v361_v51 = vld [vmem:[#allocation5 + $0x8a8] sm:$0xff] }
  0x8e   :  { %682 = vmatpush.msrb.mxu0 %v282_v52  ;;  %701 = vmatpush.msrb.mxu1 %v299_v53  ;;  %v343_v52 = vld [vmem:[#allocation5 + $0x818] sm:$0xff]  ;;  %v360_v53 = vld [vmem:[#allocation5 + $0x8a0] sm:$0xff] }
  0x8f   :  { %722 = vmatpush.msrb.mxu2 %v314_v54  ;;  %741 = vmatpush.msrb.mxu3 %v331_v55  ;;  %v342_v54 = vld [vmem:[#allocation5 + $0x810] sm:$0xff]  ;;  %v359_v55 = vld [vmem:[#allocation5 + $0x898] sm:$0xff] }
  0x90   :  { %683 = vmatpush.msrb.mxu0 %v281_v56  ;;  %702 = vmatpush.msrb.mxu1 %v298_v57  ;;  %v341_v56 = vld [vmem:[#allocation5 + $0x808] sm:$0xff]  ;;  %v358_v57 = vld [vmem:[#allocation5 + $0x890] sm:$0xff] }
  0x91   :  { %723 = vmatpush.msrb.mxu2 %v313_v58  ;;  %742 = vmatpush.msrb.mxu3 %v330_v59  ;;  %v340_v58 = vld [vmem:[#allocation5 + $0x800] sm:$0xff]  ;;  %v357_v59 = vld [vmem:[#allocation5 + $0x888] sm:$0xff] }
  0x92   :  { %684 = vmatpush.msrb.mxu0 %v280_v60  ;;  %703 = vmatpush.msrb.mxu1 %v297_v61  ;;  %v409_v60 = vld.sshfl [vmem:[#allocation1] sm:$0xff pattern:$0x73625140]  ;;  %v356_v61 = vld [vmem:[#allocation5 + $0x880] sm:$0xff] }
  0x93   :  { %724 = vmatpush.msrb.mxu2 %v312_v62  ;;  %743 = vmatpush.msrb.mxu3 %v329_v63  ;;  %v410_v62 = vld.sshfl [vmem:[#allocation1 + $0x8] sm:$0xff pattern:$0x73625140]  ;;  %v864_v63 = vld [vmem:[#allocation7] ss:$0 sm:$0xff] }
  0x94   :  { %685 = vmatpush.msrb.mxu0 %v279_v0  ;;  %704 = vmatpush.msrb.mxu1 %v296_v1 }
  0x95   :  { %725 = vmatpush.msrb.mxu2 %v311_v2  ;;  %744 = vmatpush.msrb.mxu3 %v328_v3 }
  0x96   :  { %686 = vmatpush.msrb.mxu0 %v278_v4  ;;  %705 = vmatpush.msrb.mxu1 %v295_v5 }
  0x97   :  { %726 = vmatpush.msrb.mxu2 %v310_v6  ;;  %745 = vmatpush.msrb.mxu3 %v327_v7 }
  0x98   :  { %687 = vmatpush.msrb.mxu0 %v277_v8  ;;  %706 = vmatpush.msrb.mxu1 %v294_v9 }
  0x99   :  { %727 = vmatpush.msrb.mxu2 %v309_v10  ;;  %746 = vmatpush.msrb.mxu3 %v326_v11 }
  0x9a   :  { %688 = vmatpush.msrb.mxu0 %v276_v12  ;;  %707 = vmatpush.msrb.mxu1 %v293_v13 }
  0x9b   :  { %728 = vmatpush.msrb.mxu2 %v308_v14  ;;  %747 = vmatpush.msrb.mxu3 %v325_v15 }
  0x9c   :  { %689 = vmatmul.f32.vlgmr.msrb.gmra.mxu0 %v404_v16  ;;  %729 = vmatmul.f32.vlgmr.msrb.gmra.mxu2 %v406_v17 }
  0x9d   :  { %753 = vmatpush.msra.mxu0 %v355_v18  ;;  %708 = vmatpush.msrb.mxu1 %v292_v19 }
  0x9e   :  { %748 = vmatpush.msrb.mxu3 %v324_v20  ;;  %709 = vmatmul.f32.vlgmr.msrb.gmra.mxu1 %v405_v21 }
  0x9f   :  { %749 = vmatmul.f32.vlgmr.msrb.gmra.mxu3 %v407_v22  ;;  %754 = vmatpush.msra.mxu0 %v354_v23 }
  0xa0   :  { %773 = vmatpush.msra.mxu1 %v371_v24  ;;  %803 = vmatpush.msra.mxu2 %v377_v25 }
  0xa1   :  { %755 = vmatpush.msra.mxu0 %v353_v29 }
  0xa2   :  { %774 = vmatpush.msra.mxu1 %v370_v26  ;;  %804 = vmatpush.msra.mxu2 %v376_v27 }
  0xa3   :  { %756 = vmatpush.msra.mxu0 %v352_v30 }
  0xa4   :  { %775 = vmatpush.msra.mxu1 %v369_v32  ;;  %805 = vmatpush.msra.mxu2 %v375_v33 }
  0xa5   :  { %757 = vmatpush.msra.mxu0 %v351_v34 }
  0xa6   :  { %776 = vmatpush.msra.mxu1 %v368_v28  ;;  %806 = vmatpush.msra.mxu2 %v374_v31 }
  0xa7   :  { %758 = vmatpush.msra.mxu0 %v350_v35 }
  0xa8   :  { %777 = vmatpush.msra.mxu1 %v367_v36  ;;  %807 = vmatpush.msra.mxu2 %v373_v37 }
  0xa9   :  { %759 = vmatpush.msra.mxu0 %v349_v38  ;;  %v865_v38 = vld [vmem:[#allocation8] ss:$0 sm:$0xff] }
  0xaa   :  { %778 = vmatpush.msra.mxu1 %v366_v39  ;;  %808 = vmatpush.msra.mxu2 %v372_v40 }
  0xab   :  { %760 = vmatpush.msra.mxu0 %v348_v41  ;;  %856 = vmatmul.msk.f32.vlgmr.msra.gmra.mxu2 %vm430_vm0, %v411_v42  ;;  %v866_v42 = vld [vmem:[#allocation2] ss:$0 sm:$0xff] }
  0xac   :  { %779 = vmatpush.msra.mxu1 %v365_v43 }
  0xad   :  { %761 = vmatpush.msra.mxu0 %v347_v44 }
  0xae   :  { %780 = vmatpush.msra.mxu1 %v364_v45 }
  0xaf   :  { %762 = vmatpush.msra.mxu0 %v346_v46 }
  0xb0   :  { %781 = vmatpush.msra.mxu1 %v363_v47 }
  0xb1   :  { %763 = vmatpush.msra.mxu0 %v345_v48 }
  0xb2   :  { %782 = vmatpush.msra.mxu1 %v362_v49 }
  0xb3   :  { %764 = vmatpush.msra.mxu0 %v344_v50 }
  0xb4   :  { %783 = vmatpush.msra.mxu1 %v361_v51 }
  0xb5   :  { %765 = vmatpush.msra.mxu0 %v343_v52 }
  0xb6   :  { %784 = vmatpush.msra.mxu1 %v360_v53 }
  0xb7   :  { %766 = vmatpush.msra.mxu0 %v342_v54 }
  0xb8   :  { %785 = vmatpush.msra.mxu1 %v359_v55 }
  0xb9   :  { %767 = vmatpush.msra.mxu0 %v341_v56 }
  0xba   :  { %786 = vmatpush.msra.mxu1 %v358_v57 }
  0xbb   :  { %768 = vmatpush.msra.mxu0 %v340_v58 }
  0xbc   :  { %787 = vmatpush.msra.mxu1 %v357_v59  ;;  %769 = vmatmul.f32.vlgmr.msra.gmra.mxu0 %v409_v60 }
  0xbe   :  { %788 = vmatpush.msra.mxu1 %v356_v61 }
  0xbf   :  { %789 = vmatmul.f32.vlgmr.msra.gmra.mxu1 %v410_v62 }
  0xd3   :  { %v450_v0 = vpop.f32.mrf.mxu0 }
  0xd4   :  { %v451_v1 = vadd.f32 %v864_v63, %v450_v0 }
  0xd6   :  { %v470_v2 = vpop.f32.mrf.mxu1 }
  0xd7   :  { %v471_v3 = vadd.f32 %v470_v2, %v451_v1  ;;  %v490_v4 = vpop.f32.mrf.mxu2 }
  0xd9   :  { %v491_v5 = vadd.f32 %v490_v4, %v471_v3 }
  0xda   :  { %v510_v6 = vpop.f32.mrf.mxu3 }
  0xdb   :  { %v511_v7 = vadd.f32 %v510_v6, %v491_v5 }
  0xdd   :  { %v530_v8 = vpop.f32.mrf.mxu0 }
  0xde   :  { %v531_v9 = vadd.f32 %v530_v8, %v511_v7 }
  0xe0   :  { %v550_v10 = vpop.f32.mrf.mxu1 }
  0xe1   :  { %v551_v11 = vadd.f32 %v550_v10, %v531_v9  ;;  %v570_v12 = vpop.f32.mrf.mxu2 }
  0xe3   :  { %v571_v13 = vadd.f32 %v570_v12, %v551_v11 }
  0xe4   :  { %v590_v14 = vpop.f32.mrf.mxu3 }
  0xe5   :  { %v591_v16 = vadd.f32 %v590_v14, %v571_v13 }
  0xf7   :  { %v610_v15 = vpop.f32.mrf.mxu0 }
  0xf8   :  { %v611_v17 = vadd.f32 %v610_v15, %v591_v16 }
  0xfa   :  { %v630_v18 = vpop.f32.mrf.mxu1 }
  0xfb   :  { %v631_v20 = vadd.f32 %v630_v18, %v611_v17 }
  0xfd   :  { %v650_v19 = vpop.f32.mrf.mxu2 }
  0xfe   :  { %v651_v21 = vadd.f32 %v650_v19, %v631_v20 }
 0x100   :  { %v670_v22 = vpop.f32.mrf.mxu3 }
 0x101   :  { %v671_v24 = vadd.f32 %v670_v22, %v651_v21 }
 0x119   :  { %v690_v23 = vpop.f32.mrf.mxu0 }
 0x11a   :  { %v691_v25 = vadd.f32 %v690_v23, %v671_v24 }
 0x11b   :  { %v710_v29 = vpop.f32.mrf.mxu1 }
 0x11c   :  { %v711_v27 = vadd.f32 %v710_v29, %v691_v25 }
 0x11f   :  { %v730_v26 = vpop.f32.mrf.mxu2 }
 0x120   :  { %v731_v30 = vadd.f32 %v730_v26, %v711_v27 }
 0x122   :  { %v750_v32 = vpop.f32.mrf.mxu3 }
 0x123   :  { %v751_v33 = vadd.f32 %v750_v32, %v731_v30 }
 0x12e   :  { %v810_v35 = vpop.f32.mrf.mxu2 }
 0x139   :  { %v770_v34 = vpop.f32.mrf.mxu0 }
 0x13a   :  { %v771_v28 = vadd.f32 %v770_v34, %v751_v33 }
 0x13c   :  { %v790_v31 = vpop.f32.mrf.mxu1 }
 0x13d   :  { %v791_v36 = vadd.f32 %v790_v31, %v771_v28 }
 0x13f   :  { %v811_v37 = vadd.f32 %v810_v35, %v791_v36 }
 0x141   :  { %v813_v39 = vmax.f32 %v811_v37, 0.0 }
 0x143   :  { %v818_v40 = vmul.f32 %v865_v38, %v813_v39 }
 0x145   :  { %v820_v41 = vsel %vm819_vm1, %v818_v40, 0.0 }
 0x146   :  { %821 = vadd.xlane.f32.xlu0 %v820_v41 }
 0x1b9   :  { %v822_v43 = vpop.xlane.xlu0 %821 }
 0x1ba   :  { %v827_v44 = vadd.f32 %v866_v42, %v822_v43 }
 0x1bc   :  { %v857_v45 = vmul.f32 -1.442695, %v827_v44 }
 0x1be   :  { %867 = vpow2.f32 %v857_v45 }
 0x1c4   :  { %v868_v46 = vpop.eup %867 }
 0x1c5   :  { %v831_v47 = vadd.f32 1.0, %v868_v46 }
 0x1c7   :  { %869 = vrcp.f32 %v831_v47  ;;  %v843_v51 = vand.u32 2147483648, %v831_v47  ;;  %v841_v53 = vand.u32 2147483647, %v831_v47  ;;  %vm837_vm3 = vweird.f32 %v831_v47 }
 0x1c9   :  { %v844_v55 = vor.u32 1.1754944e-38, %v843_v51  ;;  %vm842_vm6 = vcmp.eq.f32.partialorder %v841_v53, 8.507059e+37 }
 0x1cd   :  { %v870_v48 = vpop.eup %869 }
 0x1ce   :  { %v833_v49 = vmul.f32 %v870_v48, %v831_v47  ;;  %vm838_vm2 = vweird.f32 %v870_v48 }
 0x1cf   :  { %vm839_vm4 = vmor %vm837_vm3, %vm838_vm2 }
 0x1d0   :  { %v834_v50 = vsub.f32 1.0, %v833_v49 }
 0x1d2   :  { %v835_v52 = vmul.f32 %v870_v48, %v834_v50 }
 0x1d4   :  { %v836_v54 = vadd.f32 %v870_v48, %v835_v52 }
 0x1d6   :  { %v840_v56 = vsel %vm839_vm4, %v870_v48, %v836_v54 }
 0x1d7   :  { %v845_v57 = vsel %vm842_vm6, %v844_v55, %v840_v56 }
 0x1d8   :  { %848 = vst.msk [vmem:[%s1065_s5] sm:$0x3] %vm847_vm5, %v845_v57 }
 0x1d9   :  { %853 = vsyncpa [#allocation4], 1 }
 0x1da   :  { %854 = vsyncpa [#allocation6], 1 }
 0x1db   :  { %855 = vsyncpa [#allocation9], 1 }

</bundles_post_ra>
